<compile_context>
chip_gen: v7x
topology: tpu7x:2x2x1
jax: 0.10.0
libtpu: 0.0.40
codegen_flags: <defaults>
</compile_context>

<pallas_src>
import numpy as np

import jax
import jax.numpy as jnp
from jax.experimental import pallas as pl
from jax.experimental.pallas import tpu as pltpu


_VMEM_SPEC = pl.BlockSpec(memory_space=pltpu.MemorySpace.VMEM)
_LANE = 128
_NEG = -1e9
_LN_EPS = 1e-5


class Config:
    seq_len = 8
    nod_num = 4
    d_channels = 4
    mlp_out_chans = 32
    d_model = 32          # == mlp_out_chans
    nhead = 4
    dim_ffn = 64
    num_layers = 1
    num_fc_layers = 1
    drop_prob = 0.0
    t_mask_rate = 0.25
    s_mask_rate = 0.5


# ----------------------------------------------------------------------------
# Masks (static; reference re-shuffles t_mask per forward -> TODO above)
# ----------------------------------------------------------------------------

def make_masks(cfg, seed=0):
    rng = np.random.RandomState(seed)
    L, N = cfg.seq_len, cfg.nod_num
    t_mask_num = int(cfg.t_mask_rate * L)
    s_mask_num = int(cfg.s_mask_rate * N)

    t_mask = np.hstack([np.zeros(L - t_mask_num, dtype=bool),
                        np.ones(t_mask_num, dtype=bool)])
    rng.shuffle(t_mask)

    s_mask = np.zeros((L, N), dtype=bool)
    for t in range(L):
        s_mask[t, rng.permutation(N)[:s_mask_num]] = True

    return {
        "s_mask": s_mask,
        "t_mask": t_mask,
        "vis_idx": np.nonzero(~t_mask)[0],
        "msk_idx": np.nonzero(t_mask)[0],
    }


# ----------------------------------------------------------------------------
# Raw (un-packed) parameters — used both for packing and for the JAX reference
# ----------------------------------------------------------------------------

def init_raw_params(cfg, key):
    keys = iter(jax.random.split(key, 256))

    def randn(shape, scale=1.0):
        return np.asarray(scale * jax.random.normal(next(keys), shape,
                                                    dtype=jnp.float32))

    def zeros(n): return np.zeros((n,), np.float32)
    def ones(n):  return np.ones((n,), np.float32)

    L, N, C = cfg.seq_len, cfg.nod_num, cfg.d_channels
    NC, D, F = N * C, cfg.d_model, cfg.dim_ffn
    nf = cfg.mlp_out_chans * 2

    def tlayer():
        return {
            "wq": randn((D, D), 0.02), "bq": zeros(D),
            "wk": randn((D, D), 0.02), "bk": zeros(D),
            "wv": randn((D, D), 0.02), "bv": zeros(D),
            "wo": randn((D, D), 0.02), "bo": zeros(D),
            "ln1g": ones(D), "ln1b": zeros(D),
            "w1": randn((D, F), 0.02), "b1": zeros(F),
            "w2": randn((F, D), 0.02), "b2": zeros(D),
            "ln2g": ones(D), "ln2b": zeros(D),
        }

    raw = {
        "s_token": randn((L, N, C)),
        "t_token": randn((L, cfg.mlp_out_chans)),
        "pos": randn((L, D)),
        "se_w0": randn((NC, nf), 0.02), "se_b0": zeros(nf),
        "se_wout": randn((nf, cfg.mlp_out_chans), 0.02),
        "se_bout": zeros(cfg.mlp_out_chans),
        "lin_w": randn((D, NC), 0.02), "lin_b": zeros(NC),
        "t_layers": [tlayer() for _ in range(cfg.num_layers)],
        "d_layers": [tlayer() for _ in range(cfg.num_layers)],
    }
    for i in range(cfg.num_fc_layers):
        raw[f"se_wh{i}"] = randn((nf, nf), 0.02)
        raw[f"se_bh{i}"] = zeros(nf)
    return raw


# ----------------------------------------------------------------------------
# One-time packing of every parameter / static constant into a single
# (rows, 128) f32 slab.  Each block starts at an 8-aligned sublane offset.
# ----------------------------------------------------------------------------

class _Packer:
    def __init__(self, lane=_LANE):
        self.lane = lane
        self.blocks, self.offsets, self.row = [], {}, 0

    def add(self, name, arr):
        arr = np.asarray(arr, dtype=np.float32)
        if arr.ndim == 1:
            arr = arr[None, :]
        r, c = arr.shape
        assert c <= self.lane, (name, arr.shape)
        rp = ((r + 7) // 8) * 8
        buf = np.zeros((rp, self.lane), np.float32)
        buf[:r, :c] = arr
        self.offsets[name] = (self.row, r, c)
        self.blocks.append(buf)
        self.row += rp

    def finish(self):
        return np.concatenate(self.blocks, axis=0), dict(self.offsets)


def pack_params(cfg, batch, raw, masks):
    L, N, C = cfg.seq_len, cfg.nod_num, cfg.d_channels
    NC, D, H = N * C, cfg.d_model, cfg.nhead
    dh = D // H
    B, BL = batch, batch * L
    vis = ~masks["t_mask"]
    vis_idx, msk_idx = masks["vis_idx"], masks["msk_idx"]
    assert L * NC <= _LANE, "lane-dense output assumes L*N*C <= 128"

    pk = _Packer()

    # --- spatial-mask blend constants (pre-tiled over batch) -----------------
    m_nc = np.repeat(masks["s_mask"].astype(np.float32), C, axis=1)   # (L, NC)
    pk.add("keep", np.tile(1.0 - m_nc, (B, 1)))
    pk.add("stm", np.tile(m_nc * raw["s_token"].reshape(L, NC), (B, 1)))

    # --- SpatialEncoder MLP ---------------------------------------------------
    pk.add("se_w0", raw["se_w0"]); pk.add("se_b0", raw["se_b0"])
    for i in range(cfg.num_fc_layers):
        pk.add(f"se_wh{i}", raw[f"se_wh{i}"]); pk.add(f"se_bh{i}", raw[f"se_bh{i}"])
    pk.add("se_wout", raw["se_wout"]); pk.add("se_bout", raw["se_bout"])

    # --- transformer layers: packed QKV, 1/sqrt(dh) folded into Q -----------
    scale = 1.0 / np.sqrt(dh)

    def add_layer(pre, p):
        pk.add(pre + "wqkv",
               np.concatenate([p["wq"] * scale, p["wk"], p["wv"]], axis=1))
        pk.add(pre + "bqkv",
               np.concatenate([p["bq"] * scale, p["bk"], p["bv"]]))
        for nm in ("wo", "bo", "ln1g", "ln1b", "w1", "b1", "w2", "b2",
                   "ln2g", "ln2b"):
            pk.add(pre + nm, p[nm])

    for li, p in enumerate(raw["t_layers"]):
        add_layer(f"t{li}_", p)
    for li, p in enumerate(raw["d_layers"]):
        add_layer(f"d{li}_", p)

    # --- additive attention masks (block-diagonal batching) ------------------
    rb = np.arange(BL) // L
    rt = np.arange(BL) % L
    same = rb[:, None] == rb[None, :]
    visr = vis[rt]
    pk.add("tmask", np.where(same & visr[:, None] & visr[None, :], 0.0, _NEG))
    pk.add("dmask", np.where(same, 0.0, _NEG))

    # --- decoder-input assembly:  feat = h * rowvis + base -------------------
    base = raw["pos"].copy()                       # (L, D)
    base[~vis] += raw["t_token"][~vis]             # masked rows: t_token + pos
    pk.add("base", np.tile(base, (B, 1)))
    pk.add("rowvis",
           np.tile(np.repeat(vis.astype(np.float32)[:, None], D, axis=1), (B, 1)))

    # --- final linear folded into a lane-dense (B, L*NC) output assembly -----
    #       out = s2 @ ((h @ wwide) * outmask) + btile
    #     out row-order matches the reference ([visible..., masked...]).
    order = np.concatenate([vis_idx, msk_idx])
    wwide = np.zeros((D, L * NC), np.float32)
    outmask = np.zeros((BL, L * NC), np.float32)
    for s in range(L):
        wwide[:, s * NC:(s + 1) * NC] = raw["lin_w"]
        t = int(order[s])
        for b in range(B):
            outmask[b * L + t, s * NC:(s + 1) * NC] = 1.0
    pk.add("wwide", wwide)
    pk.add("outmask", outmask)
    pk.add("btile", np.tile(raw["lin_b"], L))
    pk.add("s2", (rb[None, :] == np.arange(B)[:, None]).astype(np.float32))

    return pk.finish()


# ----------------------------------------------------------------------------
# The single fused kernel
# ----------------------------------------------------------------------------

def make_fused_kernel(cfg, offs):
    D, H = cfg.d_model, cfg.nhead
    dh = D // H
    f32 = jnp.float32

    def kernel(x_ref, p_ref, o_ref):
        def g(name):
            r0, r, c = offs[name]
            return p_ref[r0:r0 + r, 0:c]

        def layer_norm(v, gn, bn):
            mu = jnp.mean(v, axis=-1, keepdims=True)
            vc = v - mu
            var = jnp.mean(vc * vc, axis=-1, keepdims=True)
            return vc * jax.lax.rsqrt(var + _LN_EPS) * g(gn) + g(bn)

        def tlayer(h, pre, mask_name):
            qkv = (jnp.dot(h, g(pre + "wqkv"), preferred_element_type=f32)
                   + g(pre + "bqkv"))
            amask = g(mask_name)
            wo = g(pre + "wo")
            attn = None
            for hd in range(H):
                c0 = hd * dh
                q = qkv[:, c0:c0 + dh]                       # scale pre-folded
                k = qkv[:, D + c0:D + c0 + dh]
                v = qkv[:, 2 * D + c0:2 * D + c0 + dh]
                s = jnp.dot(q, k.T, preferred_element_type=f32) + amask
                s = s - jnp.max(s, axis=-1, keepdims=True)
                p = jnp.exp(s)
                p = p / jnp.sum(p, axis=-1, keepdims=True)   # exact softmax
                # W_o folded per head -> no head/batch concatenates.
                contrib = jnp.dot(jnp.dot(p, v, preferred_element_type=f32),
                                  wo[c0:c0 + dh, :],
                                  preferred_element_type=f32)
                attn = contrib if attn is None else attn + contrib
            attn = attn + g(pre + "bo")
            h1 = layer_norm(h + attn, pre + "ln1g", pre + "ln1b")
            f = jnp.dot(h1, g(pre + "w1"), preferred_element_type=f32) + g(pre + "b1")
            # TODO(synk): exact erf GELU not available; tanh approximation.
            f = jax.nn.gelu(f, approximate=True)
            f = jnp.dot(f, g(pre + "w2"), preferred_element_type=f32) + g(pre + "b2")
            return layer_norm(h1 + f, pre + "ln2g", pre + "ln2b")

        # spatial-mask blend (single FMA with pre-tiled constants)
        h = x_ref[...] * g("keep") + g("stm")

        # SpatialEncoder (per-timestep 1x1-conv MLP stack) on all B*L rows
        h = jnp.maximum(
            jnp.dot(h, g("se_w0"), preferred_element_type=f32) + g("se_b0"), 0.0)
        for i in range(cfg.num_fc_layers):
            h = jnp.maximum(
                jnp.dot(h, g(f"se_wh{i}"), preferred_element_type=f32)
                + g(f"se_bh{i}"), 0.0)
        h = jnp.dot(h, g("se_wout"), preferred_element_type=f32) + g("se_bout")

        # TemporalEncoder: all rows in one pass; additive mask restricts
        # attention to (same batch, visible query, visible key); masked rows
        # carry dead values that are dropped below.
        for li in range(cfg.num_layers):
            h = tlayer(h, f"t{li}_", "tmask")

        # decoder input: visible rows -> h + pos, masked rows -> t_token + pos
        h = h * g("rowvis") + g("base")

        # Decoder: block-diagonal (per-batch) attention
        for li in range(cfg.num_layers):
            h = tlayer(h, f"d{li}_", "dmask")

        # final linear + lane-dense (B, L*N*C) output assembly
        yw = jnp.dot(h, g("wwide"), preferred_element_type=f32)
        o_ref[...] = (jnp.dot(g("s2"), yw * g("outmask"),
                              preferred_element_type=f32) + g("btile"))

    return kernel


def make_forward(cfg, batch, offsets):
    L, N, C = cfg.seq_len, cfg.nod_num, cfg.d_channels
    NC = N * C
    call = pl.pallas_call(
        make_fused_kernel(cfg, offsets),
        out_shape=jax.ShapeDtypeStruct((batch, L * NC), jnp.float32),
        in_specs=[_VMEM_SPEC, _VMEM_SPEC],
        out_specs=_VMEM_SPEC,
    )

    def forward(x, slab):
        B_, C_, N_, L_ = x.shape
        # (B, C, N, L) -> (B, L, N, C) -> (B*L, N*C); only glue left in XLA.
        xall = jnp.transpose(x, (0, 3, 2, 1)).reshape(B_ * L_, N_ * C_)
        out = call(xall, slab)                        # (B, L*N*C), lane-dense
        return out.reshape(B_, L_, N_, C_)

    return forward


# ----------------------------------------------------------------------------
# Plain-JAX mirror of the PyTorch module (for a correctness cross-check)
# ----------------------------------------------------------------------------

def reference_forward(x, raw, masks, cfg):
    B, C, N, L = x.shape
    NC, D, H = N * C, cfg.d_model, cfg.nhead
    dh = D // H
    hp = jax.lax.Precision.HIGHEST

    def mm(a, w):
        return jnp.einsum("bsd,de->bse", a, w, precision=hp)

    def ln(z, g, b):
        mu = jnp.mean(z, -1, keepdims=True)
        zc = z - mu
        var = jnp.mean(zc * zc, -1, keepdims=True)
        return zc * jax.lax.rsqrt(var + _LN_EPS) * g + b

    def tlayer(v, p):
        B_, S_, _ = v.shape
        q = (mm(v, p["wq"]) + p["bq"]).reshape(B_, S_, H, dh)
        k = (mm(v, p["wk"]) + p["bk"]).reshape(B_, S_, H, dh)
        u = (mm(v, p["wv"]) + p["bv"]).reshape(B_, S_, H, dh)
        s = jnp.einsum("bqhd,bkhd->bhqk", q, k, precision=hp) / np.sqrt(dh)
        a = jax.nn.softmax(s, axis=-1)
        o = jnp.einsum("bhqk,bkhd->bqhd", a, u, precision=hp).reshape(B_, S_, D)
        o = mm(o, p["wo"]) + p["bo"]
        h1 = ln(v + o, p["ln1g"], p["ln1b"])
        f = jax.nn.gelu(mm(h1, p["w1"]) + p["b1"], approximate=True)
        f = mm(f, p["w2"]) + p["b2"]
        return ln(h1 + f, p["ln2g"], p["ln2b"])

    xp = jnp.transpose(x, (0, 3, 2, 1))                          # (B, L, N, C)
    sm = jnp.asarray(masks["s_mask"])[None, :, :, None]
    xp = jnp.where(sm, jnp.asarray(raw["s_token"])[None], xp)
    h = xp.reshape(B, L, NC)

    h = jax.nn.relu(mm(h, raw["se_w0"]) + raw["se_b0"])
    for i in range(cfg.num_fc_layers):
        h = jax.nn.relu(mm(h, raw[f"se_wh{i}"]) + raw[f"se_bh{i}"])
    h = mm(h, raw["se_wout"]) + raw["se_bout"]

    hv = h[:, masks["vis_idx"]]
    for p in raw["t_layers"]:
        hv = tlayer(hv, p)

    pos_v = raw["pos"][masks["vis_idx"]]
    pos_m = raw["pos"][masks["msk_idx"]]
    tok_m = raw["t_token"][masks["msk_idx"]]
    feat_m = jnp.broadcast_to(jnp.asarray(tok_m + pos_m)[None],
                              (B, len(masks["msk_idx"]), D))
    feat = jnp.concatenate([hv + pos_v[None], feat_m], axis=1)

    for p in raw["d_layers"]:
        feat = tlayer(feat, p)

    out = mm(feat, raw["lin_w"]) + raw["lin_b"]
    return out.reshape(B, L, N, C)


# ----------------------------------------------------------------------------
# main
# ----------------------------------------------------------------------------

if __name__ == "__main__":
    cfg = Config()
    B = 2

    key = jax.random.PRNGKey(0)
    k_param, k_x = jax.random.split(key)

    masks = make_masks(cfg, seed=0)
    raw = init_raw_params(cfg, k_param)
    slab_np, offsets = pack_params(cfg, B, raw, masks)    # one-time packing
    slab = jnp.asarray(slab_np)

    fwd = jax.jit(make_forward(cfg, B, offsets))

    # input: (bats, chan=d_channels, node=nod_num, seql=seq_len)
    x = jax.random.normal(k_x, (B, cfg.d_channels, cfg.nod_num, cfg.seq_len),
                          dtype=jnp.float32)

    out = jax.block_until_ready(fwd(x, slab))

    assert out.shape == (B, cfg.seq_len, cfg.nod_num, cfg.d_channels)
    assert bool(jnp.all(jnp.isfinite(out)))

    # cross-check the fused kernel against the plain-JAX mirror of the module
    ref = reference_forward(x, raw, masks, cfg)
    err = float(jnp.max(jnp.abs(out - ref)))
    assert err < 2e-2, f"kernel/reference mismatch: max abs err = {err}"

    print("KERNEL_OK")
</pallas_src>

<mosaic_0001>
module attributes {stable_mosaic.version = 11 : i64} {
  func.func @kernel(%arg0: memref<16x16xf32, #tpu.memory_space<vmem>>, %arg1: memref<776x128xf32, #tpu.memory_space<vmem>>, %arg2: memref<2x128xf32, #tpu.memory_space<vmem>>) attributes {dimension_semantics = [], scalar_prefetch = 0 : i64, scratch_operands = 0 : i64, tpu.core_type = #tpu.core_type<tc>} {
    %c0 = arith.constant 0 : index
    %c0_0 = arith.constant 0 : index
    %0 = vector.load %arg0[%c0, %c0_0] : memref<16x16xf32, #tpu.memory_space<vmem>>, vector<16x16xf32>
    %c0_1 = arith.constant 0 : index
    %c0_2 = arith.constant 0 : index
    %1 = vector.load %arg1[%c0_1, %c0_2] : memref<776x128xf32, #tpu.memory_space<vmem>>, vector<16x16xf32>
    %2 = arith.mulf %0, %1 : vector<16x16xf32>
    %c16 = arith.constant 16 : index
    %c0_3 = arith.constant 0 : index
    %3 = vector.load %arg1[%c16, %c0_3] : memref<776x128xf32, #tpu.memory_space<vmem>>, vector<16x16xf32>
    %4 = arith.addf %2, %3 : vector<16x16xf32>
    %c32 = arith.constant 32 : index
    %c0_4 = arith.constant 0 : index
    %5 = vector.load %arg1[%c32, %c0_4] : memref<776x128xf32, #tpu.memory_space<vmem>>, vector<16x64xf32>
    %cst = arith.constant dense<0.000000e+00> : vector<16x64xf32>
    %6 = tpu.matmul %4, %5, %cst {dimension_numbers = #tpu.dot_dimension_numbers<[1], [0], [0], [1], [0, 0, 1, 1], [], []>} : vector<16x16xf32>, vector<16x64xf32>, vector<16x64xf32> -> vector<16x64xf32>
    %c48 = arith.constant 48 : index
    %c0_5 = arith.constant 0 : index
    %7 = vector.load %arg1[%c48, %c0_5] : memref<776x128xf32, #tpu.memory_space<vmem>>, vector<1x64xf32>
    %8 = vector.broadcast %7 : vector<1x64xf32> to vector<16x64xf32>
    %9 = arith.addf %6, %8 : vector<16x64xf32>
    %cst_6 = arith.constant 0.000000e+00 : f32
    %10 = vector.broadcast %cst_6 : f32 to vector<16x64xf32>
    %11 = arith.maximumf %9, %10 : vector<16x64xf32>
    %c56 = arith.constant 56 : index
    %c0_7 = arith.constant 0 : index
    %12 = vector.load %arg1[%c56, %c0_7] : memref<776x128xf32, #tpu.memory_space<vmem>>, vector<64x64xf32>
    %cst_8 = arith.constant dense<0.000000e+00> : vector<16x64xf32>
    %13 = tpu.matmul %11, %12, %cst_8 {dimension_numbers = #tpu.dot_dimension_numbers<[1], [0], [0], [1], [0, 0, 1, 1], [], []>} : vector<16x64xf32>, vector<64x64xf32>, vector<16x64xf32> -> vector<16x64xf32>
    %c120 = arith.constant 120 : index
    %c0_9 = arith.constant 0 : index
    %14 = vector.load %arg1[%c120, %c0_9] : memref<776x128xf32, #tpu.memory_space<vmem>>, vector<1x64xf32>
    %15 = vector.broadcast %14 : vector<1x64xf32> to vector<16x64xf32>
    %16 = arith.addf %13, %15 : vector<16x64xf32>
    %cst_10 = arith.constant 0.000000e+00 : f32
    %17 = vector.broadcast %cst_10 : f32 to vector<16x64xf32>
    %18 = arith.maximumf %16, %17 : vector<16x64xf32>
    %c128 = arith.constant 128 : index
    %c0_11 = arith.constant 0 : index
    %19 = vector.load %arg1[%c128, %c0_11] : memref<776x128xf32, #tpu.memory_space<vmem>>, vector<64x32xf32>
    %cst_12 = arith.constant dense<0.000000e+00> : vector<16x32xf32>
    %20 = tpu.matmul %18, %19, %cst_12 {dimension_numbers = #tpu.dot_dimension_numbers<[1], [0], [0], [1], [0, 0, 1, 1], [], []>} : vector<16x64xf32>, vector<64x32xf32>, vector<16x32xf32> -> vector<16x32xf32>
    %c192 = arith.constant 192 : index
    %c0_13 = arith.constant 0 : index
    %21 = vector.load %arg1[%c192, %c0_13] : memref<776x128xf32, #tpu.memory_space<vmem>>, vector<1x32xf32>
    %22 = vector.broadcast %21 : vector<1x32xf32> to vector<16x32xf32>
    %23 = arith.addf %20, %22 : vector<16x32xf32>
    %c200 = arith.constant 200 : index
    %c0_14 = arith.constant 0 : index
    %24 = vector.load %arg1[%c200, %c0_14] : memref<776x128xf32, #tpu.memory_space<vmem>>, vector<32x96xf32>
    %cst_15 = arith.constant dense<0.000000e+00> : vector<16x96xf32>
    %25 = tpu.matmul %23, %24, %cst_15 {dimension_numbers = #tpu.dot_dimension_numbers<[1], [0], [0], [1], [0, 0, 1, 1], [], []>} : vector<16x32xf32>, vector<32x96xf32>, vector<16x96xf32> -> vector<16x96xf32>
    %c232 = arith.constant 232 : index
    %c0_16 = arith.constant 0 : index
    %26 = vector.load %arg1[%c232, %c0_16] : memref<776x128xf32, #tpu.memory_space<vmem>>, vector<1x96xf32>
    %27 = vector.broadcast %26 : vector<1x96xf32> to vector<16x96xf32>
    %28 = arith.addf %25, %27 : vector<16x96xf32>
    %c648 = arith.constant 648 : index
    %c0_17 = arith.constant 0 : index
    %29 = vector.load %arg1[%c648, %c0_17] : memref<776x128xf32, #tpu.memory_space<vmem>>, vector<16x16xf32>
    %c240 = arith.constant 240 : index
    %c0_18 = arith.constant 0 : index
    %30 = vector.load %arg1[%c240, %c0_18] : memref<776x128xf32, #tpu.memory_space<vmem>>, vector<32x32xf32>
    %31 = vector.extract_strided_slice %28 {offsets = [0, 0], sizes = [16, 8], strides = [1, 1]} : vector<16x96xf32> to vector<16x8xf32>
    %32 = vector.extract_strided_slice %28 {offsets = [0, 32], sizes = [16, 8], strides = [1, 1]} : vector<16x96xf32> to vector<16x8xf32>
    %33 = vector.extract_strided_slice %28 {offsets = [0, 64], sizes = [16, 8], strides = [1, 1]} : vector<16x96xf32> to vector<16x8xf32>
    %34 = tpu.transpose %32, [1, 0] : vector<16x8xf32> -> vector<8x16xf32>
    %cst_19 = arith.constant dense<0.000000e+00> : vector<16x16xf32>
    %35 = tpu.matmul %31, %34, %cst_19 {dimension_numbers = #tpu.dot_dimension_numbers<[1], [0], [0], [1], [0, 0, 1, 1], [], []>} : vector<16x8xf32>, vector<8x16xf32>, vector<16x16xf32> -> vector<16x16xf32>
    %36 = arith.addf %35, %29 : vector<16x16xf32>
    %cst_20 = arith.constant dense<0xFF800000> : vector<16xf32>
    %37 = vector.multi_reduction <maximumf>, %36, %cst_20 [1] : vector<16x16xf32> to vector<16xf32>
    %38 = vector.shape_cast %37 : vector<16xf32> to vector<16x1xf32>
    %39 = vector.broadcast %38 : vector<16x1xf32> to vector<16x16xf32>
    %40 = arith.subf %36, %39 : vector<16x16xf32>
    %41 = math.exp %40 : vector<16x16xf32>
    %cst_21 = arith.constant dense<0.000000e+00> : vector<16xf32>
    %42 = vector.multi_reduction <add>, %41, %cst_21 [1] : vector<16x16xf32> to vector<16xf32>
    %43 = vector.shape_cast %42 : vector<16xf32> to vector<16x1xf32>
    %44 = vector.broadcast %43 : vector<16x1xf32> to vector<16x16xf32>
    %45 = arith.divf %41, %44 : vector<16x16xf32>
    %cst_22 = arith.constant dense<0.000000e+00> : vector<16x8xf32>
    %46 = tpu.matmul %45, %33, %cst_22 {dimension_numbers = #tpu.dot_dimension_numbers<[1], [0], [0], [1], [0, 0, 1, 1], [], []>} : vector<16x16xf32>, vector<16x8xf32>, vector<16x8xf32> -> vector<16x8xf32>
    %47 = vector.extract_strided_slice %30 {offsets = [0, 0], sizes = [8, 32], strides = [1, 1]} : vector<32x32xf32> to vector<8x32xf32>
    %cst_23 = arith.constant dense<0.000000e+00> : vector<16x32xf32>
    %48 = tpu.matmul %46, %47, %cst_23 {dimension_numbers = #tpu.dot_dimension_numbers<[1], [0], [0], [1], [0, 0, 1, 1], [], []>} : vector<16x8xf32>, vector<8x32xf32>, vector<16x32xf32> -> vector<16x32xf32>
    %49 = vector.extract_strided_slice %28 {offsets = [0, 8], sizes = [16, 8], strides = [1, 1]} : vector<16x96xf32> to vector<16x8xf32>
    %50 = vector.extract_strided_slice %28 {offsets = [0, 40], sizes = [16, 8], strides = [1, 1]} : vector<16x96xf32> to vector<16x8xf32>
    %51 = vector.extract_strided_slice %28 {offsets = [0, 72], sizes = [16, 8], strides = [1, 1]} : vector<16x96xf32> to vector<16x8xf32>
    %52 = tpu.transpose %50, [1, 0] : vector<16x8xf32> -> vector<8x16xf32>
    %cst_24 = arith.constant dense<0.000000e+00> : vector<16x16xf32>
    %53 = tpu.matmul %49, %52, %cst_24 {dimension_numbers = #tpu.dot_dimension_numbers<[1], [0], [0], [1], [0, 0, 1, 1], [], []>} : vector<16x8xf32>, vector<8x16xf32>, vector<16x16xf32> -> vector<16x16xf32>
    %54 = arith.addf %53, %29 : vector<16x16xf32>
    %cst_25 = arith.constant dense<0xFF800000> : vector<16xf32>
    %55 = vector.multi_reduction <maximumf>, %54, %cst_25 [1] : vector<16x16xf32> to vector<16xf32>
    %56 = vector.shape_cast %55 : vector<16xf32> to vector<16x1xf32>
    %57 = vector.broadcast %56 : vector<16x1xf32> to vector<16x16xf32>
    %58 = arith.subf %54, %57 : vector<16x16xf32>
    %59 = math.exp %58 : vector<16x16xf32>
    %cst_26 = arith.constant dense<0.000000e+00> : vector<16xf32>
    %60 = vector.multi_reduction <add>, %59, %cst_26 [1] : vector<16x16xf32> to vector<16xf32>
    %61 = vector.shape_cast %60 : vector<16xf32> to vector<16x1xf32>
    %62 = vector.broadcast %61 : vector<16x1xf32> to vector<16x16xf32>
    %63 = arith.divf %59, %62 : vector<16x16xf32>
    %cst_27 = arith.constant dense<0.000000e+00> : vector<16x8xf32>
    %64 = tpu.matmul %63, %51, %cst_27 {dimension_numbers = #tpu.dot_dimension_numbers<[1], [0], [0], [1], [0, 0, 1, 1], [], []>} : vector<16x16xf32>, vector<16x8xf32>, vector<16x8xf32> -> vector<16x8xf32>
    %65 = vector.extract_strided_slice %30 {offsets = [8, 0], sizes = [8, 32], strides = [1, 1]} : vector<32x32xf32> to vector<8x32xf32>
    %cst_28 = arith.constant dense<0.000000e+00> : vector<16x32xf32>
    %66 = tpu.matmul %64, %65, %cst_28 {dimension_numbers = #tpu.dot_dimension_numbers<[1], [0], [0], [1], [0, 0, 1, 1], [], []>} : vector<16x8xf32>, vector<8x32xf32>, vector<16x32xf32> -> vector<16x32xf32>
    %67 = arith.addf %48, %66 : vector<16x32xf32>
    %68 = vector.extract_strided_slice %28 {offsets = [0, 16], sizes = [16, 8], strides = [1, 1]} : vector<16x96xf32> to vector<16x8xf32>
    %69 = vector.extract_strided_slice %28 {offsets = [0, 48], sizes = [16, 8], strides = [1, 1]} : vector<16x96xf32> to vector<16x8xf32>
    %70 = vector.extract_strided_slice %28 {offsets = [0, 80], sizes = [16, 8], strides = [1, 1]} : vector<16x96xf32> to vector<16x8xf32>
    %71 = tpu.transpose %69, [1, 0] : vector<16x8xf32> -> vector<8x16xf32>
    %cst_29 = arith.constant dense<0.000000e+00> : vector<16x16xf32>
    %72 = tpu.matmul %68, %71, %cst_29 {dimension_numbers = #tpu.dot_dimension_numbers<[1], [0], [0], [1], [0, 0, 1, 1], [], []>} : vector<16x8xf32>, vector<8x16xf32>, vector<16x16xf32> -> vector<16x16xf32>
    %73 = arith.addf %72, %29 : vector<16x16xf32>
    %cst_30 = arith.constant dense<0xFF800000> : vector<16xf32>
    %74 = vector.multi_reduction <maximumf>, %73, %cst_30 [1] : vector<16x16xf32> to vector<16xf32>
    %75 = vector.shape_cast %74 : vector<16xf32> to vector<16x1xf32>
    %76 = vector.broadcast %75 : vector<16x1xf32> to vector<16x16xf32>
    %77 = arith.subf %73, %76 : vector<16x16xf32>
    %78 = math.exp %77 : vector<16x16xf32>
    %cst_31 = arith.constant dense<0.000000e+00> : vector<16xf32>
    %79 = vector.multi_reduction <add>, %78, %cst_31 [1] : vector<16x16xf32> to vector<16xf32>
    %80 = vector.shape_cast %79 : vector<16xf32> to vector<16x1xf32>
    %81 = vector.broadcast %80 : vector<16x1xf32> to vector<16x16xf32>
    %82 = arith.divf %78, %81 : vector<16x16xf32>
    %cst_32 = arith.constant dense<0.000000e+00> : vector<16x8xf32>
    %83 = tpu.matmul %82, %70, %cst_32 {dimension_numbers = #tpu.dot_dimension_numbers<[1], [0], [0], [1], [0, 0, 1, 1], [], []>} : vector<16x16xf32>, vector<16x8xf32>, vector<16x8xf32> -> vector<16x8xf32>
    %84 = vector.extract_strided_slice %30 {offsets = [16, 0], sizes = [8, 32], strides = [1, 1]} : vector<32x32xf32> to vector<8x32xf32>
    %cst_33 = arith.constant dense<0.000000e+00> : vector<16x32xf32>
    %85 = tpu.matmul %83, %84, %cst_33 {dimension_numbers = #tpu.dot_dimension_numbers<[1], [0], [0], [1], [0, 0, 1, 1], [], []>} : vector<16x8xf32>, vector<8x32xf32>, vector<16x32xf32> -> vector<16x32xf32>
    %86 = arith.addf %67, %85 : vector<16x32xf32>
    %87 = vector.extract_strided_slice %28 {offsets = [0, 24], sizes = [16, 8], strides = [1, 1]} : vector<16x96xf32> to vector<16x8xf32>
    %88 = vector.extract_strided_slice %28 {offsets = [0, 56], sizes = [16, 8], strides = [1, 1]} : vector<16x96xf32> to vector<16x8xf32>
    %89 = vector.extract_strided_slice %28 {offsets = [0, 88], sizes = [16, 8], strides = [1, 1]} : vector<16x96xf32> to vector<16x8xf32>
    %90 = tpu.transpose %88, [1, 0] : vector<16x8xf32> -> vector<8x16xf32>
    %cst_34 = arith.constant dense<0.000000e+00> : vector<16x16xf32>
    %91 = tpu.matmul %87, %90, %cst_34 {dimension_numbers = #tpu.dot_dimension_numbers<[1], [0], [0], [1], [0, 0, 1, 1], [], []>} : vector<16x8xf32>, vector<8x16xf32>, vector<16x16xf32> -> vector<16x16xf32>
    %92 = arith.addf %91, %29 : vector<16x16xf32>
    %cst_35 = arith.constant dense<0xFF800000> : vector<16xf32>
    %93 = vector.multi_reduction <maximumf>, %92, %cst_35 [1] : vector<16x16xf32> to vector<16xf32>
    %94 = vector.shape_cast %93 : vector<16xf32> to vector<16x1xf32>
    %95 = vector.broadcast %94 : vector<16x1xf32> to vector<16x16xf32>
    %96 = arith.subf %92, %95 : vector<16x16xf32>
    %97 = math.exp %96 : vector<16x16xf32>
    %cst_36 = arith.constant dense<0.000000e+00> : vector<16xf32>
    %98 = vector.multi_reduction <add>, %97, %cst_36 [1] : vector<16x16xf32> to vector<16xf32>
    %99 = vector.shape_cast %98 : vector<16xf32> to vector<16x1xf32>
    %100 = vector.broadcast %99 : vector<16x1xf32> to vector<16x16xf32>
    %101 = arith.divf %97, %100 : vector<16x16xf32>
    %cst_37 = arith.constant dense<0.000000e+00> : vector<16x8xf32>
    %102 = tpu.matmul %101, %89, %cst_37 {dimension_numbers = #tpu.dot_dimension_numbers<[1], [0], [0], [1], [0, 0, 1, 1], [], []>} : vector<16x16xf32>, vector<16x8xf32>, vector<16x8xf32> -> vector<16x8xf32>
    %103 = vector.extract_strided_slice %30 {offsets = [24, 0], sizes = [8, 32], strides = [1, 1]} : vector<32x32xf32> to vector<8x32xf32>
    %cst_38 = arith.constant dense<0.000000e+00> : vector<16x32xf32>
    %104 = tpu.matmul %102, %103, %cst_38 {dimension_numbers = #tpu.dot_dimension_numbers<[1], [0], [0], [1], [0, 0, 1, 1], [], []>} : vector<16x8xf32>, vector<8x32xf32>, vector<16x32xf32> -> vector<16x32xf32>
    %105 = arith.addf %86, %104 : vector<16x32xf32>
    %c272 = arith.constant 272 : index
    %c0_39 = arith.constant 0 : index
    %106 = vector.load %arg1[%c272, %c0_39] : memref<776x128xf32, #tpu.memory_space<vmem>>, vector<1x32xf32>
    %107 = vector.broadcast %106 : vector<1x32xf32> to vector<16x32xf32>
    %108 = arith.addf %105, %107 : vector<16x32xf32>
    %109 = arith.addf %23, %108 : vector<16x32xf32>
    %cst_40 = arith.constant dense<0.000000e+00> : vector<16xf32>
    %110 = vector.multi_reduction <add>, %109, %cst_40 [1] : vector<16x32xf32> to vector<16xf32>
    %111 = vector.shape_cast %110 : vector<16xf32> to vector<16x1xf32>
    %cst_41 = arith.constant 3.200000e+01 : f32
    %112 = vector.broadcast %cst_41 : f32 to vector<16x1xf32>
    %113 = arith.divf %111, %112 : vector<16x1xf32>
    %114 = vector.broadcast %113 : vector<16x1xf32> to vector<16x32xf32>
    %115 = arith.subf %109, %114 : vector<16x32xf32>
    %116 = arith.mulf %115, %115 : vector<16x32xf32>
    %cst_42 = arith.constant dense<0.000000e+00> : vector<16xf32>
    %117 = vector.multi_reduction <add>, %116, %cst_42 [1] : vector<16x32xf32> to vector<16xf32>
    %118 = vector.shape_cast %117 : vector<16xf32> to vector<16x1xf32>
    %cst_43 = arith.constant 3.200000e+01 : f32
    %119 = vector.broadcast %cst_43 : f32 to vector<16x1xf32>
    %120 = arith.divf %118, %119 : vector<16x1xf32>
    %cst_44 = arith.constant 9.99999974E-6 : f32
    %121 = vector.broadcast %cst_44 : f32 to vector<16x1xf32>
    %122 = arith.addf %120, %121 : vector<16x1xf32>
    %123 = math.rsqrt %122 : vector<16x1xf32>
    %124 = vector.broadcast %123 : vector<16x1xf32> to vector<16x32xf32>
    %125 = arith.mulf %115, %124 : vector<16x32xf32>
    %c280 = arith.constant 280 : index
    %c0_45 = arith.constant 0 : index
    %126 = vector.load %arg1[%c280, %c0_45] : memref<776x128xf32, #tpu.memory_space<vmem>>, vector<1x32xf32>
    %127 = vector.broadcast %126 : vector<1x32xf32> to vector<16x32xf32>
    %128 = arith.mulf %125, %127 : vector<16x32xf32>
    %c288 = arith.constant 288 : index
    %c0_46 = arith.constant 0 : index
    %129 = vector.load %arg1[%c288, %c0_46] : memref<776x128xf32, #tpu.memory_space<vmem>>, vector<1x32xf32>
    %130 = vector.broadcast %129 : vector<1x32xf32> to vector<16x32xf32>
    %131 = arith.addf %128, %130 : vector<16x32xf32>
    %c296 = arith.constant 296 : index
    %c0_47 = arith.constant 0 : index
    %132 = vector.load %arg1[%c296, %c0_47] : memref<776x128xf32, #tpu.memory_space<vmem>>, vector<32x64xf32>
    %cst_48 = arith.constant dense<0.000000e+00> : vector<16x64xf32>
    %133 = tpu.matmul %131, %132, %cst_48 {dimension_numbers = #tpu.dot_dimension_numbers<[1], [0], [0], [1], [0, 0, 1, 1], [], []>} : vector<16x32xf32>, vector<32x64xf32>, vector<16x64xf32> -> vector<16x64xf32>
    %c328 = arith.constant 328 : index
    %c0_49 = arith.constant 0 : index
    %134 = vector.load %arg1[%c328, %c0_49] : memref<776x128xf32, #tpu.memory_space<vmem>>, vector<1x64xf32>
    %135 = vector.broadcast %134 : vector<1x64xf32> to vector<16x64xf32>
    %136 = arith.addf %133, %135 : vector<16x64xf32>
    %137 = arith.mulf %136, %136 : vector<16x64xf32>
    %138 = arith.mulf %136, %137 : vector<16x64xf32>
    %cst_50 = arith.constant 4.471500e-02 : f32
    %139 = vector.broadcast %cst_50 : f32 to vector<16x64xf32>
    %140 = arith.mulf %139, %138 : vector<16x64xf32>
    %141 = arith.addf %136, %140 : vector<16x64xf32>
    %cst_51 = arith.constant 0.797884583 : f32
    %142 = vector.broadcast %cst_51 : f32 to vector<16x64xf32>
    %143 = arith.mulf %142, %141 : vector<16x64xf32>
    %144 = math.tanh %143 : vector<16x64xf32>
    %cst_52 = arith.constant 1.000000e+00 : f32
    %145 = vector.broadcast %cst_52 : f32 to vector<16x64xf32>
    %146 = arith.addf %145, %144 : vector<16x64xf32>
    %cst_53 = arith.constant 5.000000e-01 : f32
    %147 = vector.broadcast %cst_53 : f32 to vector<16x64xf32>
    %148 = arith.mulf %147, %146 : vector<16x64xf32>
    %149 = arith.mulf %136, %148 : vector<16x64xf32>
    %c336 = arith.constant 336 : index
    %c0_54 = arith.constant 0 : index
    %150 = vector.load %arg1[%c336, %c0_54] : memref<776x128xf32, #tpu.memory_space<vmem>>, vector<64x32xf32>
    %cst_55 = arith.constant dense<0.000000e+00> : vector<16x32xf32>
    %151 = tpu.matmul %149, %150, %cst_55 {dimension_numbers = #tpu.dot_dimension_numbers<[1], [0], [0], [1], [0, 0, 1, 1], [], []>} : vector<16x64xf32>, vector<64x32xf32>, vector<16x32xf32> -> vector<16x32xf32>
    %c400 = arith.constant 400 : index
    %c0_56 = arith.constant 0 : index
    %152 = vector.load %arg1[%c400, %c0_56] : memref<776x128xf32, #tpu.memory_space<vmem>>, vector<1x32xf32>
    %153 = vector.broadcast %152 : vector<1x32xf32> to vector<16x32xf32>
    %154 = arith.addf %151, %153 : vector<16x32xf32>
    %155 = arith.addf %131, %154 : vector<16x32xf32>
    %cst_57 = arith.constant dense<0.000000e+00> : vector<16xf32>
    %156 = vector.multi_reduction <add>, %155, %cst_57 [1] : vector<16x32xf32> to vector<16xf32>
    %157 = vector.shape_cast %156 : vector<16xf32> to vector<16x1xf32>
    %cst_58 = arith.constant 3.200000e+01 : f32
    %158 = vector.broadcast %cst_58 : f32 to vector<16x1xf32>
    %159 = arith.divf %157, %158 : vector<16x1xf32>
    %160 = vector.broadcast %159 : vector<16x1xf32> to vector<16x32xf32>
    %161 = arith.subf %155, %160 : vector<16x32xf32>
    %162 = arith.mulf %161, %161 : vector<16x32xf32>
    %cst_59 = arith.constant dense<0.000000e+00> : vector<16xf32>
    %163 = vector.multi_reduction <add>, %162, %cst_59 [1] : vector<16x32xf32> to vector<16xf32>
    %164 = vector.shape_cast %163 : vector<16xf32> to vector<16x1xf32>
    %cst_60 = arith.constant 3.200000e+01 : f32
    %165 = vector.broadcast %cst_60 : f32 to vector<16x1xf32>
    %166 = arith.divf %164, %165 : vector<16x1xf32>
    %cst_61 = arith.constant 9.99999974E-6 : f32
    %167 = vector.broadcast %cst_61 : f32 to vector<16x1xf32>
    %168 = arith.addf %166, %167 : vector<16x1xf32>
    %169 = math.rsqrt %168 : vector<16x1xf32>
    %170 = vector.broadcast %169 : vector<16x1xf32> to vector<16x32xf32>
    %171 = arith.mulf %161, %170 : vector<16x32xf32>
    %c408 = arith.constant 408 : index
    %c0_62 = arith.constant 0 : index
    %172 = vector.load %arg1[%c408, %c0_62] : memref<776x128xf32, #tpu.memory_space<vmem>>, vector<1x32xf32>
    %173 = vector.broadcast %172 : vector<1x32xf32> to vector<16x32xf32>
    %174 = arith.mulf %171, %173 : vector<16x32xf32>
    %c416 = arith.constant 416 : index
    %c0_63 = arith.constant 0 : index
    %175 = vector.load %arg1[%c416, %c0_63] : memref<776x128xf32, #tpu.memory_space<vmem>>, vector<1x32xf32>
    %176 = vector.broadcast %175 : vector<1x32xf32> to vector<16x32xf32>
    %177 = arith.addf %174, %176 : vector<16x32xf32>
    %c696 = arith.constant 696 : index
    %c0_64 = arith.constant 0 : index
    %178 = vector.load %arg1[%c696, %c0_64] : memref<776x128xf32, #tpu.memory_space<vmem>>, vector<16x32xf32>
    %179 = arith.mulf %177, %178 : vector<16x32xf32>
    %c680 = arith.constant 680 : index
    %c0_65 = arith.constant 0 : index
    %180 = vector.load %arg1[%c680, %c0_65] : memref<776x128xf32, #tpu.memory_space<vmem>>, vector<16x32xf32>
    %181 = arith.addf %179, %180 : vector<16x32xf32>
    %c424 = arith.constant 424 : index
    %c0_66 = arith.constant 0 : index
    %182 = vector.load %arg1[%c424, %c0_66] : memref<776x128xf32, #tpu.memory_space<vmem>>, vector<32x96xf32>
    %cst_67 = arith.constant dense<0.000000e+00> : vector<16x96xf32>
    %183 = tpu.matmul %181, %182, %cst_67 {dimension_numbers = #tpu.dot_dimension_numbers<[1], [0], [0], [1], [0, 0, 1, 1], [], []>} : vector<16x32xf32>, vector<32x96xf32>, vector<16x96xf32> -> vector<16x96xf32>
    %c456 = arith.constant 456 : index
    %c0_68 = arith.constant 0 : index
    %184 = vector.load %arg1[%c456, %c0_68] : memref<776x128xf32, #tpu.memory_space<vmem>>, vector<1x96xf32>
    %185 = vector.broadcast %184 : vector<1x96xf32> to vector<16x96xf32>
    %186 = arith.addf %183, %185 : vector<16x96xf32>
    %c664 = arith.constant 664 : index
    %c0_69 = arith.constant 0 : index
    %187 = vector.load %arg1[%c664, %c0_69] : memref<776x128xf32, #tpu.memory_space<vmem>>, vector<16x16xf32>
    %c464 = arith.constant 464 : index
    %c0_70 = arith.constant 0 : index
    %188 = vector.load %arg1[%c464, %c0_70] : memref<776x128xf32, #tpu.memory_space<vmem>>, vector<32x32xf32>
    %189 = vector.extract_strided_slice %186 {offsets = [0, 0], sizes = [16, 8], strides = [1, 1]} : vector<16x96xf32> to vector<16x8xf32>
    %190 = vector.extract_strided_slice %186 {offsets = [0, 32], sizes = [16, 8], strides = [1, 1]} : vector<16x96xf32> to vector<16x8xf32>
    %191 = vector.extract_strided_slice %186 {offsets = [0, 64], sizes = [16, 8], strides = [1, 1]} : vector<16x96xf32> to vector<16x8xf32>
    %192 = tpu.transpose %190, [1, 0] : vector<16x8xf32> -> vector<8x16xf32>
    %cst_71 = arith.constant dense<0.000000e+00> : vector<16x16xf32>
    %193 = tpu.matmul %189, %192, %cst_71 {dimension_numbers = #tpu.dot_dimension_numbers<[1], [0], [0], [1], [0, 0, 1, 1], [], []>} : vector<16x8xf32>, vector<8x16xf32>, vector<16x16xf32> -> vector<16x16xf32>
    %194 = arith.addf %193, %187 : vector<16x16xf32>
    %cst_72 = arith.constant dense<0xFF800000> : vector<16xf32>
    %195 = vector.multi_reduction <maximumf>, %194, %cst_72 [1] : vector<16x16xf32> to vector<16xf32>
    %196 = vector.shape_cast %195 : vector<16xf32> to vector<16x1xf32>
    %197 = vector.broadcast %196 : vector<16x1xf32> to vector<16x16xf32>
    %198 = arith.subf %194, %197 : vector<16x16xf32>
    %199 = math.exp %198 : vector<16x16xf32>
    %cst_73 = arith.constant dense<0.000000e+00> : vector<16xf32>
    %200 = vector.multi_reduction <add>, %199, %cst_73 [1] : vector<16x16xf32> to vector<16xf32>
    %201 = vector.shape_cast %200 : vector<16xf32> to vector<16x1xf32>
    %202 = vector.broadcast %201 : vector<16x1xf32> to vector<16x16xf32>
    %203 = arith.divf %199, %202 : vector<16x16xf32>
    %cst_74 = arith.constant dense<0.000000e+00> : vector<16x8xf32>
    %204 = tpu.matmul %203, %191, %cst_74 {dimension_numbers = #tpu.dot_dimension_numbers<[1], [0], [0], [1], [0, 0, 1, 1], [], []>} : vector<16x16xf32>, vector<16x8xf32>, vector<16x8xf32> -> vector<16x8xf32>
    %205 = vector.extract_strided_slice %188 {offsets = [0, 0], sizes = [8, 32], strides = [1, 1]} : vector<32x32xf32> to vector<8x32xf32>
    %cst_75 = arith.constant dense<0.000000e+00> : vector<16x32xf32>
    %206 = tpu.matmul %204, %205, %cst_75 {dimension_numbers = #tpu.dot_dimension_numbers<[1], [0], [0], [1], [0, 0, 1, 1], [], []>} : vector<16x8xf32>, vector<8x32xf32>, vector<16x32xf32> -> vector<16x32xf32>
    %207 = vector.extract_strided_slice %186 {offsets = [0, 8], sizes = [16, 8], strides = [1, 1]} : vector<16x96xf32> to vector<16x8xf32>
    %208 = vector.extract_strided_slice %186 {offsets = [0, 40], sizes = [16, 8], strides = [1, 1]} : vector<16x96xf32> to vector<16x8xf32>
    %209 = vector.extract_strided_slice %186 {offsets = [0, 72], sizes = [16, 8], strides = [1, 1]} : vector<16x96xf32> to vector<16x8xf32>
    %210 = tpu.transpose %208, [1, 0] : vector<16x8xf32> -> vector<8x16xf32>
    %cst_76 = arith.constant dense<0.000000e+00> : vector<16x16xf32>
    %211 = tpu.matmul %207, %210, %cst_76 {dimension_numbers = #tpu.dot_dimension_numbers<[1], [0], [0], [1], [0, 0, 1, 1], [], []>} : vector<16x8xf32>, vector<8x16xf32>, vector<16x16xf32> -> vector<16x16xf32>
    %212 = arith.addf %211, %187 : vector<16x16xf32>
    %cst_77 = arith.constant dense<0xFF800000> : vector<16xf32>
    %213 = vector.multi_reduction <maximumf>, %212, %cst_77 [1] : vector<16x16xf32> to vector<16xf32>
    %214 = vector.shape_cast %213 : vector<16xf32> to vector<16x1xf32>
    %215 = vector.broadcast %214 : vector<16x1xf32> to vector<16x16xf32>
    %216 = arith.subf %212, %215 : vector<16x16xf32>
    %217 = math.exp %216 : vector<16x16xf32>
    %cst_78 = arith.constant dense<0.000000e+00> : vector<16xf32>
    %218 = vector.multi_reduction <add>, %217, %cst_78 [1] : vector<16x16xf32> to vector<16xf32>
    %219 = vector.shape_cast %218 : vector<16xf32> to vector<16x1xf32>
    %220 = vector.broadcast %219 : vector<16x1xf32> to vector<16x16xf32>
    %221 = arith.divf %217, %220 : vector<16x16xf32>
    %cst_79 = arith.constant dense<0.000000e+00> : vector<16x8xf32>
    %222 = tpu.matmul %221, %209, %cst_79 {dimension_numbers = #tpu.dot_dimension_numbers<[1], [0], [0], [1], [0, 0, 1, 1], [], []>} : vector<16x16xf32>, vector<16x8xf32>, vector<16x8xf32> -> vector<16x8xf32>
    %223 = vector.extract_strided_slice %188 {offsets = [8, 0], sizes = [8, 32], strides = [1, 1]} : vector<32x32xf32> to vector<8x32xf32>
    %cst_80 = arith.constant dense<0.000000e+00> : vector<16x32xf32>
    %224 = tpu.matmul %222, %223, %cst_80 {dimension_numbers = #tpu.dot_dimension_numbers<[1], [0], [0], [1], [0, 0, 1, 1], [], []>} : vector<16x8xf32>, vector<8x32xf32>, vector<16x32xf32> -> vector<16x32xf32>
    %225 = arith.addf %206, %224 : vector<16x32xf32>
    %226 = vector.extract_strided_slice %186 {offsets = [0, 16], sizes = [16, 8], strides = [1, 1]} : vector<16x96xf32> to vector<16x8xf32>
    %227 = vector.extract_strided_slice %186 {offsets = [0, 48], sizes = [16, 8], strides = [1, 1]} : vector<16x96xf32> to vector<16x8xf32>
    %228 = vector.extract_strided_slice %186 {offsets = [0, 80], sizes = [16, 8], strides = [1, 1]} : vector<16x96xf32> to vector<16x8xf32>
    %229 = tpu.transpose %227, [1, 0] : vector<16x8xf32> -> vector<8x16xf32>
    %cst_81 = arith.constant dense<0.000000e+00> : vector<16x16xf32>
    %230 = tpu.matmul %226, %229, %cst_81 {dimension_numbers = #tpu.dot_dimension_numbers<[1], [0], [0], [1], [0, 0, 1, 1], [], []>} : vector<16x8xf32>, vector<8x16xf32>, vector<16x16xf32> -> vector<16x16xf32>
    %231 = arith.addf %230, %187 : vector<16x16xf32>
    %cst_82 = arith.constant dense<0xFF800000> : vector<16xf32>
    %232 = vector.multi_reduction <maximumf>, %231, %cst_82 [1] : vector<16x16xf32> to vector<16xf32>
    %233 = vector.shape_cast %232 : vector<16xf32> to vector<16x1xf32>
    %234 = vector.broadcast %233 : vector<16x1xf32> to vector<16x16xf32>
    %235 = arith.subf %231, %234 : vector<16x16xf32>
    %236 = math.exp %235 : vector<16x16xf32>
    %cst_83 = arith.constant dense<0.000000e+00> : vector<16xf32>
    %237 = vector.multi_reduction <add>, %236, %cst_83 [1] : vector<16x16xf32> to vector<16xf32>
    %238 = vector.shape_cast %237 : vector<16xf32> to vector<16x1xf32>
    %239 = vector.broadcast %238 : vector<16x1xf32> to vector<16x16xf32>
    %240 = arith.divf %236, %239 : vector<16x16xf32>
    %cst_84 = arith.constant dense<0.000000e+00> : vector<16x8xf32>
    %241 = tpu.matmul %240, %228, %cst_84 {dimension_numbers = #tpu.dot_dimension_numbers<[1], [0], [0], [1], [0, 0, 1, 1], [], []>} : vector<16x16xf32>, vector<16x8xf32>, vector<16x8xf32> -> vector<16x8xf32>
    %242 = vector.extract_strided_slice %188 {offsets = [16, 0], sizes = [8, 32], strides = [1, 1]} : vector<32x32xf32> to vector<8x32xf32>
    %cst_85 = arith.constant dense<0.000000e+00> : vector<16x32xf32>
    %243 = tpu.matmul %241, %242, %cst_85 {dimension_numbers = #tpu.dot_dimension_numbers<[1], [0], [0], [1], [0, 0, 1, 1], [], []>} : vector<16x8xf32>, vector<8x32xf32>, vector<16x32xf32> -> vector<16x32xf32>
    %244 = arith.addf %225, %243 : vector<16x32xf32>
    %245 = vector.extract_strided_slice %186 {offsets = [0, 24], sizes = [16, 8], strides = [1, 1]} : vector<16x96xf32> to vector<16x8xf32>
    %246 = vector.extract_strided_slice %186 {offsets = [0, 56], sizes = [16, 8], strides = [1, 1]} : vector<16x96xf32> to vector<16x8xf32>
    %247 = vector.extract_strided_slice %186 {offsets = [0, 88], sizes = [16, 8], strides = [1, 1]} : vector<16x96xf32> to vector<16x8xf32>
    %248 = tpu.transpose %246, [1, 0] : vector<16x8xf32> -> vector<8x16xf32>
    %cst_86 = arith.constant dense<0.000000e+00> : vector<16x16xf32>
    %249 = tpu.matmul %245, %248, %cst_86 {dimension_numbers = #tpu.dot_dimension_numbers<[1], [0], [0], [1], [0, 0, 1, 1], [], []>} : vector<16x8xf32>, vector<8x16xf32>, vector<16x16xf32> -> vector<16x16xf32>
    %250 = arith.addf %249, %187 : vector<16x16xf32>
    %cst_87 = arith.constant dense<0xFF800000> : vector<16xf32>
    %251 = vector.multi_reduction <maximumf>, %250, %cst_87 [1] : vector<16x16xf32> to vector<16xf32>
    %252 = vector.shape_cast %251 : vector<16xf32> to vector<16x1xf32>
    %253 = vector.broadcast %252 : vector<16x1xf32> to vector<16x16xf32>
    %254 = arith.subf %250, %253 : vector<16x16xf32>
    %255 = math.exp %254 : vector<16x16xf32>
    %cst_88 = arith.constant dense<0.000000e+00> : vector<16xf32>
    %256 = vector.multi_reduction <add>, %255, %cst_88 [1] : vector<16x16xf32> to vector<16xf32>
    %257 = vector.shape_cast %256 : vector<16xf32> to vector<16x1xf32>
    %258 = vector.broadcast %257 : vector<16x1xf32> to vector<16x16xf32>
    %259 = arith.divf %255, %258 : vector<16x16xf32>
    %cst_89 = arith.constant dense<0.000000e+00> : vector<16x8xf32>
    %260 = tpu.matmul %259, %247, %cst_89 {dimension_numbers = #tpu.dot_dimension_numbers<[1], [0], [0], [1], [0, 0, 1, 1], [], []>} : vector<16x16xf32>, vector<16x8xf32>, vector<16x8xf32> -> vector<16x8xf32>
    %261 = vector.extract_strided_slice %188 {offsets = [24, 0], sizes = [8, 32], strides = [1, 1]} : vector<32x32xf32> to vector<8x32xf32>
    %cst_90 = arith.constant dense<0.000000e+00> : vector<16x32xf32>
    %262 = tpu.matmul %260, %261, %cst_90 {dimension_numbers = #tpu.dot_dimension_numbers<[1], [0], [0], [1], [0, 0, 1, 1], [], []>} : vector<16x8xf32>, vector<8x32xf32>, vector<16x32xf32> -> vector<16x32xf32>
    %263 = arith.addf %244, %262 : vector<16x32xf32>
    %c496 = arith.constant 496 : index
    %c0_91 = arith.constant 0 : index
    %264 = vector.load %arg1[%c496, %c0_91] : memref<776x128xf32, #tpu.memory_space<vmem>>, vector<1x32xf32>
    %265 = vector.broadcast %264 : vector<1x32xf32> to vector<16x32xf32>
    %266 = arith.addf %263, %265 : vector<16x32xf32>
    %267 = arith.addf %181, %266 : vector<16x32xf32>
    %cst_92 = arith.constant dense<0.000000e+00> : vector<16xf32>
    %268 = vector.multi_reduction <add>, %267, %cst_92 [1] : vector<16x32xf32> to vector<16xf32>
    %269 = vector.shape_cast %268 : vector<16xf32> to vector<16x1xf32>
    %cst_93 = arith.constant 3.200000e+01 : f32
    %270 = vector.broadcast %cst_93 : f32 to vector<16x1xf32>
    %271 = arith.divf %269, %270 : vector<16x1xf32>
    %272 = vector.broadcast %271 : vector<16x1xf32> to vector<16x32xf32>
    %273 = arith.subf %267, %272 : vector<16x32xf32>
    %274 = arith.mulf %273, %273 : vector<16x32xf32>
    %cst_94 = arith.constant dense<0.000000e+00> : vector<16xf32>
    %275 = vector.multi_reduction <add>, %274, %cst_94 [1] : vector<16x32xf32> to vector<16xf32>
    %276 = vector.shape_cast %275 : vector<16xf32> to vector<16x1xf32>
    %cst_95 = arith.constant 3.200000e+01 : f32
    %277 = vector.broadcast %cst_95 : f32 to vector<16x1xf32>
    %278 = arith.divf %276, %277 : vector<16x1xf32>
    %cst_96 = arith.constant 9.99999974E-6 : f32
    %279 = vector.broadcast %cst_96 : f32 to vector<16x1xf32>
    %280 = arith.addf %278, %279 : vector<16x1xf32>
    %281 = math.rsqrt %280 : vector<16x1xf32>
    %282 = vector.broadcast %281 : vector<16x1xf32> to vector<16x32xf32>
    %283 = arith.mulf %273, %282 : vector<16x32xf32>
    %c504 = arith.constant 504 : index
    %c0_97 = arith.constant 0 : index
    %284 = vector.load %arg1[%c504, %c0_97] : memref<776x128xf32, #tpu.memory_space<vmem>>, vector<1x32xf32>
    %285 = vector.broadcast %284 : vector<1x32xf32> to vector<16x32xf32>
    %286 = arith.mulf %283, %285 : vector<16x32xf32>
    %c512 = arith.constant 512 : index
    %c0_98 = arith.constant 0 : index
    %287 = vector.load %arg1[%c512, %c0_98] : memref<776x128xf32, #tpu.memory_space<vmem>>, vector<1x32xf32>
    %288 = vector.broadcast %287 : vector<1x32xf32> to vector<16x32xf32>
    %289 = arith.addf %286, %288 : vector<16x32xf32>
    %c520 = arith.constant 520 : index
    %c0_99 = arith.constant 0 : index
    %290 = vector.load %arg1[%c520, %c0_99] : memref<776x128xf32, #tpu.memory_space<vmem>>, vector<32x64xf32>
    %cst_100 = arith.constant dense<0.000000e+00> : vector<16x64xf32>
    %291 = tpu.matmul %289, %290, %cst_100 {dimension_numbers = #tpu.dot_dimension_numbers<[1], [0], [0], [1], [0, 0, 1, 1], [], []>} : vector<16x32xf32>, vector<32x64xf32>, vector<16x64xf32> -> vector<16x64xf32>
    %c552 = arith.constant 552 : index
    %c0_101 = arith.constant 0 : index
    %292 = vector.load %arg1[%c552, %c0_101] : memref<776x128xf32, #tpu.memory_space<vmem>>, vector<1x64xf32>
    %293 = vector.broadcast %292 : vector<1x64xf32> to vector<16x64xf32>
    %294 = arith.addf %291, %293 : vector<16x64xf32>
    %295 = arith.mulf %294, %294 : vector<16x64xf32>
    %296 = arith.mulf %294, %295 : vector<16x64xf32>
    %cst_102 = arith.constant 4.471500e-02 : f32
    %297 = vector.broadcast %cst_102 : f32 to vector<16x64xf32>
    %298 = arith.mulf %297, %296 : vector<16x64xf32>
    %299 = arith.addf %294, %298 : vector<16x64xf32>
    %cst_103 = arith.constant 0.797884583 : f32
    %300 = vector.broadcast %cst_103 : f32 to vector<16x64xf32>
    %301 = arith.mulf %300, %299 : vector<16x64xf32>
    %302 = math.tanh %301 : vector<16x64xf32>
    %cst_104 = arith.constant 1.000000e+00 : f32
    %303 = vector.broadcast %cst_104 : f32 to vector<16x64xf32>
    %304 = arith.addf %303, %302 : vector<16x64xf32>
    %cst_105 = arith.constant 5.000000e-01 : f32
    %305 = vector.broadcast %cst_105 : f32 to vector<16x64xf32>
    %306 = arith.mulf %305, %304 : vector<16x64xf32>
    %307 = arith.mulf %294, %306 : vector<16x64xf32>
    %c560 = arith.constant 560 : index
    %c0_106 = arith.constant 0 : index
    %308 = vector.load %arg1[%c560, %c0_106] : memref<776x128xf32, #tpu.memory_space<vmem>>, vector<64x32xf32>
    %cst_107 = arith.constant dense<0.000000e+00> : vector<16x32xf32>
    %309 = tpu.matmul %307, %308, %cst_107 {dimension_numbers = #tpu.dot_dimension_numbers<[1], [0], [0], [1], [0, 0, 1, 1], [], []>} : vector<16x64xf32>, vector<64x32xf32>, vector<16x32xf32> -> vector<16x32xf32>
    %c624 = arith.constant 624 : index
    %c0_108 = arith.constant 0 : index
    %310 = vector.load %arg1[%c624, %c0_108] : memref<776x128xf32, #tpu.memory_space<vmem>>, vector<1x32xf32>
    %311 = vector.broadcast %310 : vector<1x32xf32> to vector<16x32xf32>
    %312 = arith.addf %309, %311 : vector<16x32xf32>
    %313 = arith.addf %289, %312 : vector<16x32xf32>
    %cst_109 = arith.constant dense<0.000000e+00> : vector<16xf32>
    %314 = vector.multi_reduction <add>, %313, %cst_109 [1] : vector<16x32xf32> to vector<16xf32>
    %315 = vector.shape_cast %314 : vector<16xf32> to vector<16x1xf32>
    %cst_110 = arith.constant 3.200000e+01 : f32
    %316 = vector.broadcast %cst_110 : f32 to vector<16x1xf32>
    %317 = arith.divf %315, %316 : vector<16x1xf32>
    %318 = vector.broadcast %317 : vector<16x1xf32> to vector<16x32xf32>
    %319 = arith.subf %313, %318 : vector<16x32xf32>
    %320 = arith.mulf %319, %319 : vector<16x32xf32>
    %cst_111 = arith.constant dense<0.000000e+00> : vector<16xf32>
    %321 = vector.multi_reduction <add>, %320, %cst_111 [1] : vector<16x32xf32> to vector<16xf32>
    %322 = vector.shape_cast %321 : vector<16xf32> to vector<16x1xf32>
    %cst_112 = arith.constant 3.200000e+01 : f32
    %323 = vector.broadcast %cst_112 : f32 to vector<16x1xf32>
    %324 = arith.divf %322, %323 : vector<16x1xf32>
    %cst_113 = arith.constant 9.99999974E-6 : f32
    %325 = vector.broadcast %cst_113 : f32 to vector<16x1xf32>
    %326 = arith.addf %324, %325 : vector<16x1xf32>
    %327 = math.rsqrt %326 : vector<16x1xf32>
    %328 = vector.broadcast %327 : vector<16x1xf32> to vector<16x32xf32>
    %329 = arith.mulf %319, %328 : vector<16x32xf32>
    %c632 = arith.constant 632 : index
    %c0_114 = arith.constant 0 : index
    %330 = vector.load %arg1[%c632, %c0_114] : memref<776x128xf32, #tpu.memory_space<vmem>>, vector<1x32xf32>
    %331 = vector.broadcast %330 : vector<1x32xf32> to vector<16x32xf32>
    %332 = arith.mulf %329, %331 : vector<16x32xf32>
    %c640 = arith.constant 640 : index
    %c0_115 = arith.constant 0 : index
    %333 = vector.load %arg1[%c640, %c0_115] : memref<776x128xf32, #tpu.memory_space<vmem>>, vector<1x32xf32>
    %334 = vector.broadcast %333 : vector<1x32xf32> to vector<16x32xf32>
    %335 = arith.addf %332, %334 : vector<16x32xf32>
    %c712 = arith.constant 712 : index
    %c0_116 = arith.constant 0 : index
    %336 = vector.load %arg1[%c712, %c0_116] : memref<776x128xf32, #tpu.memory_space<vmem>>, vector<32x128xf32>
    %cst_117 = arith.constant dense<0.000000e+00> : vector<16x128xf32>
    %337 = tpu.matmul %335, %336, %cst_117 {dimension_numbers = #tpu.dot_dimension_numbers<[1], [0], [0], [1], [0, 0, 1, 1], [], []>} : vector<16x32xf32>, vector<32x128xf32>, vector<16x128xf32> -> vector<16x128xf32>
    %c768 = arith.constant 768 : index
    %c0_118 = arith.constant 0 : index
    %338 = vector.load %arg1[%c768, %c0_118] : memref<776x128xf32, #tpu.memory_space<vmem>>, vector<2x16xf32>
    %c744 = arith.constant 744 : index
    %c0_119 = arith.constant 0 : index
    %339 = vector.load %arg1[%c744, %c0_119] : memref<776x128xf32, #tpu.memory_space<vmem>>, vector<16x128xf32>
    %340 = arith.mulf %337, %339 : vector<16x128xf32>
    %cst_120 = arith.constant dense<0.000000e+00> : vector<2x128xf32>
    %341 = tpu.matmul %338, %340, %cst_120 {dimension_numbers = #tpu.dot_dimension_numbers<[1], [0], [0], [1], [0, 0, 1, 1], [], []>} : vector<2x16xf32>, vector<16x128xf32>, vector<2x128xf32> -> vector<2x128xf32>
    %c760 = arith.constant 760 : index
    %c0_121 = arith.constant 0 : index
    %342 = vector.load %arg1[%c760, %c0_121] : memref<776x128xf32, #tpu.memory_space<vmem>>, vector<1x128xf32>
    %343 = vector.broadcast %342 : vector<1x128xf32> to vector<2x128xf32>
    %344 = arith.addf %341, %343 : vector<2x128xf32>
    %c0_122 = arith.constant 0 : index
    %c0_123 = arith.constant 0 : index
    %345 = vector.load %arg2[%c0_122, %c0_123] : memref<2x128xf32, #tpu.memory_space<vmem>>, vector<2x128xf32>
    tpu.vector_store %arg2[%c0_122, %c0_123], %344 {strides = array<i32>} : memref<2x128xf32, #tpu.memory_space<vmem>>, vector<2x128xf32>,
    return
  }
}

</mosaic_0001>

<bundles_post_ra>
// kernel: forward.1
= control target key start
LH: loop header
LB: loop body
LE: loop exit
PB: predicated region body
PF: predicated region fallthrough
CT: control target
= control target key end

     0   :  { %7 = vsyncpa [#allocation3], 0  ;;  %s4511_s9 = smov [#allocation2]   ;;  %s4839_s0 = inlined_call_operand.vmem [shape: f32[16,16], index: 0, kind: input, shape index: {}]   ;;  %s4840_s1 = inlined_call_operand.hbm [shape: f32[776,128], index: 1, kind: input, shape index: {}]   ;;  %s4841_s2 = inlined_call_operand.vmem [shape: f32[2,128], index: 2, kind: output, shape index: {}]  }
   0x1   :  { %s15_s10 = sshll.u32 %s4511_s9, 4  ;;  %s4487_s13 = scalar_lea.hbm %s4840_s1, 12416  ;;  %s16_s10 = int_to_ptr.vmem [resolvable:$true] %s15_s10 }
   0x2   :  { %p4488_p0 = scmp.ne.s32.totalorder %s4840_s1, %s4487_s13  ;;  %p4491_p1 = scmp.lt.u32.totalorder %s4487_s13, %s4840_s1 }
   0x4   :  { %p4493_p2 = pnand %p4491_p1, %p4488_p0 }
   0x6   :  { %4496 = shalt.err (!%p4493_p2)
}
   0x7   :  { %s4497_s18 = scalar_lea.vmem %s16_s10, 12416  ;;  %p4502_p4 = scmp.lt.s32.totalorder %s16_s10, %s16_s10 }
   0x8   :  { %p4498_p3 = scmp.ne.s32.totalorder %s16_s10, %s4497_s18  ;;  %p4503_p5 = scmp.lt.s32.totalorder %s4497_s18, %s4497_s18 }
   0xa   :  { %p4504_p6 = por %p4503_p5, %p4502_p4 }
   0xc   :  { %p4505_p7 = pnand %p4504_p6, %p4498_p3 }
   0xe   :  { %4508 = shalt.err (!%p4505_p7)
}
   0xf   :  { %s4512_s19 = smov 128   ;;  %s4513_s20 = smov 8  }
  0x10   :  { %21 = dma.hbm_to_vmem [thread:$0]  %s4840_s1, 12416, %s16_s10, [#allocation3], %s4512_s19, %s4512_s19, %s4513_s20  }
  0x11   :  { %4509 = dma.done.wait [#allocation3], 12416  }
  0x12   :  { %4510 = vsyncadd [#allocation3], 4294954880  ;;  %v35_v0 = vld [vmem:[#allocation2 + $0x20] sm:$0xff]  ;;  %v36_v1 = vld [vmem:[#allocation2 + $0x28] sm:$0xff]  ;;  %vm42_vm0 = vcmask 130048   ;;  %vm139_vm1 = vcmask 523264  }
  0x13   :  { %v25_v2 = vld [vmem:[%s4839_s0] sm:$0xff]  ;;  %v4099_v3 = vpack.c.bf16 %v36_v1, %v35_v0  ;;  %v31_v5 = vld [vmem:[#allocation2 + $0x10] sm:$0xff]  ;;  %v26_v6 = vld [vmem:[%s4839_s0 + $0x8] sm:$0xff]  ;;  %vm326_vm2 = vcmask 261120   ;;  %vm420_vm3 = vcmask 64512   ;;  %s4514_s0 = smov 120  }
  0x14   :  { %v27_v4 = vld [vmem:[#allocation2] sm:$0xff]  ;;  %v28_v8 = vld [vmem:[#allocation2 + $0x8] sm:$0xff]  ;;  %v32_v9 = vld [vmem:[#allocation2 + $0x18] sm:$0xff]  ;;  %s4515_s1 = smov 96   ;;  %s4516_s27 = smov 88   ;;  %vm4526_vm5 = vmmov 0  }
  0x15   :  { %v29_v7 = vmul.f32 %v27_v4, %v25_v2  ;;  %v126_v10 = vld [vmem:[#allocation2 + $0x38] sm:$0xff]  ;;  %4100 = vmatprep.subr.bf16.mxu0 %v4099_v3  ;;  %v30_v11 = vmul.f32 %v28_v8, %v26_v6  ;;  %v127_v12 = vld [vmem:[#allocation2 + $0x40] sm:$0xff]  ;;  %v128_v13 = vld [vmem:[#allocation2 + $0x48] sm:$0xff]  ;;  %s4517_s28 = smov 112   ;;  %s4518_s29 = smov 80  }
  0x16   :  { %v129_v14 = vld [vmem:[#allocation2 + $0x50] sm:$0xff]  ;;  %4102 = vmatpush3.bf16.msra.mxu0 %v4099_v3  ;;  %v4103_v16 = vpack.c.bf16 %v127_v12, %v126_v10  ;;  %v130_v19 = vld [vmem:[#allocation2 + $0x58] sm:$0xff]  ;;  %v131_v20 = vld [vmem:[#allocation2 + $0x60] sm:$0xff]  ;;  %s4519_s30 = smov 56   ;;  %s4520_s3 = smov 72  }
  0x17   :  { %v33_v15 = vadd.f32 %v31_v5, %v29_v7  ;;  %v4107_v17 = vpack.c.bf16 %v129_v14, %v128_v13  ;;  %v34_v18 = vadd.f32 %v32_v9, %v30_v11  ;;  %v4111_v21 = vpack.c.bf16 %v131_v20, %v130_v19  ;;  %v132_v22 = vld [vmem:[#allocation2 + $0x68] sm:$0xff]  ;;  %v133_v23 = vld [vmem:[#allocation2 + $0x70] sm:$0xff]  ;;  %v223_v25 = vld [vmem:[#allocation2 + $0x80] sm:$0xff]  ;;  %s4521_s4 = smov 64   ;;  %s4522_s5 = smov 104  }
  0x18   :  { %4104 = vmatprep.subr.bf16.mxu1 %v4103_v16  ;;  %v4115_v24 = vpack.c.bf16 %v133_v23, %v132_v22  ;;  %v224_v26 = vld [vmem:[#allocation2 + $0x88] sm:$0xff]  ;;  %v225_v27 = vld [vmem:[#allocation2 + $0x90] sm:$0xff]  ;;  %v226_v29 = vld [vmem:[#allocation2 + $0x98] sm:$0xff]  ;;  %s4523_s6 = smov 48   ;;  %s4524_s7 = smov 40  }
  0x19   :  { %3806 = vmatprep.mubr.msk.f32.mxu0 %vm42_vm0, %v33_v15  ;;  %4106 = vmatpush3.bf16.msra.mxu1 %v4103_v16  ;;  %v4119_v28 = vpack.c.bf16 %v224_v26, %v223_v25  ;;  %v4123_v30 = vpack.c.bf16 %v226_v29, %v225_v27  ;;  %v227_v31 = vld [vmem:[#allocation2 + $0xa0] sm:$0xff]  ;;  %v228_v32 = vld [vmem:[#allocation2 + $0xa8] sm:$0xff]  ;;  %v3532_v34 = vld [vmem:[#allocation2 + $0x30] ss:$0 sm:$0xff] }
  0x1a   :  { %3807 = vmatmul.mubr.msk.f32.vlgmr.msra.gmra.mrb[0].mxu0 %vm42_vm0, %v34_v18  ;;  %4108 = vmatprep.subr.bf16.mxu1 %v4107_v17  ;;  %v4127_v33 = vpack.c.bf16 %v228_v32, %v227_v31  ;;  %v229_v41 = vld [vmem:[#allocation2 + $0xb0] sm:$0xff]  ;;  %v230_v42 = vld [vmem:[#allocation2 + $0xb8] sm:$0xff]  ;;  %v317_v44 = vld [vmem:[#allocation2 + $0xc8] sm:$0xff] }
  0x1b   :  { %4120 = vmatprep.subr.bf16.mxu0 %v4119_v28  ;;  %v4131_v43 = vpack.c.bf16 %v230_v42, %v229_v41  ;;  %v318_v45 = vld [vmem:[#allocation2 + $0xd0] sm:$0xff]  ;;  %v3535_v47 = vld [vmem:[#allocation2 + $0x78] ss:$0 sm:$0xff]  ;;  %v320_v55 = vld [vmem:[#allocation2 + $0xe0] sm:$0xff] }
  0x1c   :  { %4122 = vmatpush3.bf16.msra.mxu0 %v4119_v28  ;;  %v4135_v46 = vpack.c.bf16 %v318_v45, %v317_v44  ;;  %v319_v54 = vld [vmem:[#allocation2 + $0xd8] sm:$0xff]  ;;  %v3538_v57 = vld [vmem:[#allocation2 + $0xc0] ss:$0 sm:$0xff]  ;;  %v3541_v62 = vld [vmem:[#allocation2 + $0xe8] ss:$0 sm:$0xff] }
  0x1d   :  { %4110 = vmatpush3.bf16.msra.mxu1 %v4107_v17  ;;  %4124 = vmatprep.subr.bf16.mxu0 %v4123_v30  ;;  %v4139_v56 = vpack.c.bf16 %v320_v55, %v319_v54  ;;  %vm4601_vm4 = vmpackc.low %vm420_vm3, %vm420_vm3  ;;  %v4625_v22 = vld [vmem:[#allocation2 + $0x288] sm:$0xff] }
  0x1e   :  { %4112 = vmatprep.subr.bf16.mxu1 %v4111_v21 }
  0x20   :  { %4126 = vmatpush3.bf16.msra.mxu0 %v4123_v30 }
  0x21   :  { %4114 = vmatpush3.bf16.msra.mxu1 %v4111_v21  ;;  %4128 = vmatprep.subr.bf16.mxu0 %v4127_v33  ;;  %v4623_v21 = vld [vmem:[#allocation2 + $0x290] sm:$0xff] }
  0x22   :  { %4116 = vmatprep.subr.bf16.mxu1 %v4115_v24 }
  0x24   :  { %4130 = vmatpush3.bf16.msra.mxu0 %v4127_v33 }
  0x25   :  { %4118 = vmatpush3.bf16.msra.mxu1 %v4115_v24  ;;  %4132 = vmatprep.subr.bf16.mxu0 %v4131_v43 }
  0x26   :  { %4136 = vmatprep.subr.bf16.mxu1 %v4135_v46 }
  0x28   :  { %4134 = vmatpush3.bf16.msra.mxu0 %v4131_v43 }
  0xed   :  { %v3808_v35 = vpop.f32.mrb[0].mxu0 }
  0xee   :  { %v121_v36 = vadd.f32 %v3808_v35, %v3532_v34  ;;  %v115_v37 = vpop.f32.mrb[1].mxu0 }
  0xef   :  { %v116_v38 = vadd.f32 %v3532_v34, %v115_v37 }
  0xf0   :  { %v125_v40 = vmax.f32 %v121_v36, 0.0 }
  0xf1   :  { %v124_v39 = vmax.f32 %v116_v38, 0.0 }
  0xf3   :  { %3825 = vmatprep.mubr.msk.f32.mxu1 %vm139_vm1, %v124_v39 }
  0xf4   :  { %3826 = vmatmul.mubr.msk.f32.vlgmr.msra.gmra.mrb[0].mxu1 %vm139_vm1, %v125_v40 }
  0xf5   :  { %4138 = vmatpush3.bf16.msra.mxu1 %v4135_v46 }
  0xf6   :  { %4140 = vmatprep.subr.bf16.mxu1 %v4139_v56 }
  0xf9   :  { %4142 = vmatpush3.bf16.msra.mxu1 %v4139_v56 }
 0x1c7   :  { %v3827_v48 = vpop.f32.mrb[0].mxu1 }
 0x1c8   :  { %v218_v49 = vadd.f32 %v3827_v48, %v3535_v47  ;;  %v212_v50 = vpop.f32.mrb[1].mxu1 }
 0x1c9   :  { %v213_v51 = vadd.f32 %v3535_v47, %v212_v50 }
 0x1ca   :  { %v222_v53 = vmax.f32 %v218_v49, 0.0 }
 0x1cb   :  { %v221_v52 = vmax.f32 %v213_v51, 0.0 }
 0x1cd   :  { %3844 = vmatprep.mubr.msk.f32.mxu0 %vm139_vm1, %v221_v52 }
 0x1ce   :  { %3845 = vmatmul.mubr.msk.f32.vlgmr.msra.gmra.mrb[2].mxu0 %vm139_vm1, %v222_v53 }
 0x2a1   :  { %v3846_v58 = vpop.f32.mrb[2].mxu0 }
 0x2a2   :  { %v308_v59 = vpop.f32.mrb[3].mxu0  ;;  %v4569_v61 = vadd.f32 %v3846_v58, %v3538_v57 }
 0x2a3   :  { %v4567_v60 = vadd.f32 %v3538_v57, %v308_v59 }
 0x2a5   :  { %3855 = vmatprep.mubr.msk.f32.mxu1 %vm326_vm2, %v4567_v60 }
 0x2a6   :  { %3856 = vmatmul.mubr.msk.f32.vlgmr.msra.gmra.mrb[2].mxu1 %vm326_vm2, %v4569_v61 }
 0x379   :  { %v3857_v63 = vpop.f32.mrb[2].mxu1 }
 0x37a   :  { %v4575_v0 = vadd.f32 %v3857_v63, %v3541_v62  ;;  %v399_v1 = vpop.f32.mrb[3].mxu1 }
 0x37b   :  { %v4577_v2 = vadd.f32 %v3541_v62, %v399_v1 }
 0x37d   :  { %613 = vrot.lane.b32.xlu1 %v4577_v2, %s4514_s0  ;;  %3862 = vmatprep.mubr.msk.f32.mxu0 %vm420_vm3, %v4577_v2  ;;  %v4585_v3 = vpack.i.bf16 %v4575_v0, %v4577_v2 }
 0x37f   :  { %4320 = vrot.lane.b32.xlu0 %v4585_v3, %s4515_s1 }
 0x381   :  { %615 = vrot.lane.b32.xlu1 %v4575_v0, %s4514_s0 }
 0x383   :  { %4325 = vrot.lane.b32.xlu0 %v4585_v3, %s4516_s27 }
 0x385   :  { %975 = vrot.lane.b32.xlu1 %v4577_v2, %s4517_s28 }
 0x387   :  { %4330 = vrot.lane.b32.xlu0 %v4585_v3, %s4518_s29 }
 0x38b   :  { %977 = vrot.lane.b32.xlu0 %v4575_v0, %s4517_s28 }
 0x3ef   :  { %v614_v14 = vpop.permute.xlu1 %613 }
 0x3f1   :  { %v4321_v4 = vpop.permute.xlu0 %4320 }
 0x3f2   :  { %v4323_v5 = vunpack.i.h.bf16 %v4321_v4  ;;  %v4322_v6 = vunpack.i.l.bf16 %v4321_v4 }
 0x3f3   :  { %v616_v18 = vpop.permute.xlu1 %615 }
 0x3f4   :  { %v4143_v8 = vpack.c.bf16 %v4323_v5, %v4322_v6 }
 0x3f5   :  { %v4326_v9 = vpop.permute.xlu0 %4325 }
 0x3f6   :  { %v4328_v10 = vunpack.i.h.bf16 %v4326_v9  ;;  %v4327_v11 = vunpack.i.l.bf16 %v4326_v9  ;;  %4145 = vmatprep.subr.msk.bf16.mxu0 %vm4601_vm4, %v4143_v8 }
 0x3f7   :  { %4148 = vmatpush3.bf16.xpose.msk.msra.mxu0 %vm4601_vm4, %v4143_v8  ;;  %v976_v19 = vpop.permute.xlu1 %975 }
 0x3f8   :  { %v4153_v12 = vpack.c.bf16 %v4328_v10, %v4327_v11 }
 0x3f9   :  { %v4331_v13 = vpop.permute.xlu0 %4330 }
 0x3fa   :  { %v4333_v15 = vunpack.i.h.bf16 %v4331_v13  ;;  %v4332_v16 = vunpack.i.l.bf16 %v4331_v13  ;;  %4155 = vmatprep.subr.msk.bf16.mxu0 %vm4601_vm4, %v4153_v12 }
 0x3fc   :  { %v4163_v17 = vpack.c.bf16 %v4333_v15, %v4332_v16 }
 0x3fd   :  { %v978_v20 = vpop.permute.xlu0 %977 }
 0x3fe   :  { %3863 = vmatmul.mubr.msk.f32.vlgmr.msra.gmra.mrb[4].mxu0 %vm420_vm3, %v4575_v0 }
 0x3ff   :  { %4158 = vmatpush3.bf16.xpose.msk.msra.mxu0 %vm4601_vm4, %v4153_v12  ;;  %3876 = vmatprep.mubr.msk.f32.mxu0 %vm420_vm3, %v614_v14 }
 0x400   :  { %4165 = vmatprep.subr.msk.bf16.mxu0 %vm4601_vm4, %v4163_v17 }
 0x406   :  { %3877 = vmatmul.mubr.msk.f32.vlgmr.msra.gmra.mrb[6].mxu0 %vm420_vm3, %v616_v18 }
 0x407   :  { %4168 = vmatpush3.bf16.xpose.msk.msra.mxu0 %vm4601_vm4, %v4163_v17  ;;  %3900 = vmatprep.mubr.msk.f32.mxu0 %vm420_vm3, %v976_v19 }
 0x40e   :  { %3901 = vmatmul.mubr.msk.f32.vlgmr.msra.gmra.mrb[8].mxu0 %vm420_vm3, %v978_v20 }
 0x4d1   :  { %v3864_v23 = vpop.f32.mrb[4].mxu0 }
 0x4d2   :  { %v501_v24 = vadd.f32 %v3864_v23, %v4623_v21  ;;  %v495_v25 = vpop.f32.mrb[5].mxu0 }
 0x4d3   :  { %v496_v26 = vadd.f32 %v495_v25, %v4625_v22 }
 0x4d4   :  { %v507_v27 = vsel %vm42_vm0, %v501_v24, -inf }
 0x4d5   :  { %508 = vmax.xlane.f32.xlu0 %v507_v27  ;;  %v504_v28 = vsel %vm42_vm0, %v496_v26, -inf }
 0x4d6   :  { %505 = vmax.xlane.f32.xlu1 %v504_v28 }
 0x4d9   :  { %v3878_v29 = vpop.f32.mrb[6].mxu0 }
 0x4da   :  { %v701_v30 = vadd.f32 %v3878_v29, %v4623_v21  ;;  %v695_v31 = vpop.f32.mrb[7].mxu0 }
 0x4db   :  { %v696_v32 = vadd.f32 %v695_v31, %v4625_v22 }
 0x4dc   :  { %v707_v33 = vsel %vm42_vm0, %v701_v30, -inf }
 0x4dd   :  { %708 = vmax.xlane.f32.xlu1 %v707_v33  ;;  %v704_v34 = vsel %vm42_vm0, %v696_v32, -inf }
 0x4de   :  { %705 = vmax.xlane.f32.xlu0 %v704_v34 }
 0x4e1   :  { %v3902_v35 = vpop.f32.mrb[8].mxu0 }
 0x4e2   :  { %v1057_v36 = vpop.f32.mrb[9].mxu0  ;;  %v1063_v58 = vadd.f32 %v3902_v35, %v4623_v21 }
 0x4e3   :  { %v1058_v57 = vadd.f32 %v1057_v36, %v4625_v22 }
 0x4e4   :  { %v1069_v62 = vsel %vm42_vm0, %v1063_v58, -inf }
 0x4e5   :  { %v1066_v59 = vsel %vm42_vm0, %v1058_v57, -inf }
 0x562   :  { %v509_v37 = vpop.xlane.xlu0 %508 }
 0x563   :  { %v511_v38 = vsub.f32 %v501_v24, %v509_v37  ;;  %v506_v39 = vpop.xlane.xlu1 %505 }
 0x564   :  { %v510_v40 = vsub.f32 %v496_v26, %v506_v39  ;;  %v410_v39 = vld [vmem:[#allocation2 + $0xf0] sm:$0xff] }
 0x565   :  { %v514_v41 = vmul.f32 1.442695, %v511_v38  ;;  %v411_v38 = vld [vmem:[#allocation2 + $0xf8] sm:$0xff] }
 0x566   :  { %v512_v42 = vmul.f32 1.442695, %v510_v40 }
 0x567   :  { %4399 = vpow2.f32 %v514_v41 }
 0x568   :  { %4401 = vpow2.f32 %v512_v42 }
 0x56a   :  { %v709_v43 = vpop.xlane.xlu1 %708 }
 0x56b   :  { %v711_v44 = vsub.f32 %v701_v30, %v709_v43  ;;  %v706_v45 = vpop.xlane.xlu0 %705 }
 0x56c   :  { %v710_v46 = vsub.f32 %v696_v32, %v706_v45 }
 0x56d   :  { %v714_v47 = vmul.f32 1.442695, %v711_v44 }
 0x56e   :  { %v712_v48 = vmul.f32 1.442695, %v710_v46 }
 0x56f   :  { %4403 = vpow2.f32 %v714_v47 }
 0x570   :  { %4405 = vpow2.f32 %v712_v48 }
 0x571   :  { %v4400_v49 = vpop.eup %4399 }
 0x572   :  { %v4402_v50 = vpop.eup %4401  ;;  %v519_v51 = vsel %vm42_vm0, %v4400_v49, 0.0 }
 0x573   :  { %520 = vadd.xlane.f32.xlu1 %v519_v51  ;;  %v516_v52 = vsel %vm42_vm0, %v4402_v50, 0.0 }
 0x574   :  { %517 = vadd.xlane.f32.xlu0 %v516_v52 }
 0x579   :  { %v4637_v53 = vpop.eup %4403 }
 0x57a   :  { %v4406_v54 = vpop.eup %4405  ;;  %v719_v55 = vsel %vm42_vm0, %v4637_v53, 0.0 }
 0x57b   :  { %720 = vadd.xlane.f32.xlu1 %v719_v55  ;;  %v716_v56 = vsel %vm42_vm0, %v4406_v54, 0.0 }
 0x57c   :  { %717 = vadd.xlane.f32.xlu0 %v716_v56 }
 0x58c   :  { %4340 = vrot.lane.b32.xlu1 %v4585_v3, %s4519_s30 }
 0x590   :  { %4345 = vrot.lane.b32.xlu1 %v4585_v3, %s4520_s3 }
 0x592   :  { %4335 = vrot.lane.b32.xlu0 %v4585_v3, %s4521_s4 }
 0x594   :  { %1260 = vrot.lane.b32.xlu1 %v4575_v0, %s4522_s5 }
 0x596   :  { %1258 = vrot.lane.b32.xlu0 %v4577_v2, %s4522_s5 }
 0x5b5   :  { %1067 = vmax.xlane.f32.xlu0 %v1066_v59 }
 0x5b8   :  { %1070 = vmax.xlane.f32.xlu1 %v1069_v62 }
 0x5c9   :  { %4350 = vrot.lane.b32.xlu1 %v4585_v3, %s4523_s6 }
 0x5cd   :  { %4355 = vrot.lane.b32.xlu1 %v4585_v3, %s4524_s7 }
 0x600   :  { %v521_v0 = vpop.xlane.xlu1 %520 }
 0x601   :  { %v518_v63 = vpop.xlane.xlu0 %517 }
 0x602   :  { %4407 = vrcp.f32 %v518_v63 }
 0x603   :  { %4409 = vrcp.f32 %v521_v0 }
 0x608   :  { %v721_v1 = vpop.xlane.xlu1 %720 }
 0x609   :  { %v718_v2 = vpop.xlane.xlu0 %717 }
 0x60a   :  { %4411 = vrcp.f32 %v718_v2 }
 0x60b   :  { %4413 = vrcp.f32 %v721_v1 }
 0x60c   :  { %v4408_v4 = vpop.eup %4407  ;;  %v4341_v5 = vpop.permute.xlu1 %4340 }
 0x60d   :  { %v4336_v6 = vpop.permute.xlu0 %4335  ;;  %v523_v8 = vmul.f32 %v4408_v4, %v4402_v50  ;;  %v4343_v9 = vunpack.i.h.bf16 %v4341_v5  ;;  %v4342_v10 = vunpack.i.l.bf16 %v4341_v5  ;;  %v4410_v14 = vpop.eup %4409 }
 0x60e   :  { %v4338_v11 = vunpack.i.h.bf16 %v4336_v6  ;;  %v4337_v12 = vunpack.i.l.bf16 %v4336_v6  ;;  %v525_v23 = vmul.f32 %v4410_v14, %v4400_v49  ;;  %v413_v14 = vld [vmem:[#allocation2 + $0x108] sm:$0xff] }
 0x60f   :  { %3869 = vmatprep.mubr.msk.f32.mxu1 %vm42_vm0, %v523_v8  ;;  %v4159_v18 = vpack.c.bf16 %v4343_v9, %v4342_v10 }
 0x610   :  { %v4149_v13 = vpack.c.bf16 %v4338_v11, %v4337_v12  ;;  %v4346_v3 = vpop.permute.xlu1 %4345 }
 0x611   :  { %v4348_v15 = vunpack.i.h.bf16 %v4346_v3  ;;  %v4347_v16 = vunpack.i.l.bf16 %v4346_v3  ;;  %v1259_v17 = vpop.permute.xlu0 %1258 }
 0x612   :  { %4150 = vmatprep.subr.bf16.mxu1 %v4149_v13  ;;  %3919 = vmatprep.mubr.msk.f32.mxu0 %vm420_vm3, %v1259_v17 }
 0x613   :  { %v4173_v19 = vpack.c.bf16 %v4348_v15, %v4347_v16  ;;  %4152 = vmatpush3.bf16.msra.mxu1 %v4149_v13 }
 0x614   :  { %v4412_v20 = vpop.eup %4411  ;;  %4160 = vmatprep.subr.bf16.mxu1 %v4159_v18  ;;  %v1261_v27 = vpop.permute.xlu1 %1260 }
 0x615   :  { %v4414_v24 = vpop.eup %4413  ;;  %4175 = vmatprep.subr.msk.bf16.mxu0 %vm4601_vm4, %v4173_v19  ;;  %v723_v25 = vmul.f32 %v4412_v20, %v4406_v54 }
 0x616   :  { %3870 = vmatmul.mubr.msk.f32.vlgmr.msra.gmra.mrb[4].mxu1 %vm42_vm0, %v525_v23  ;;  %4178 = vmatpush3.bf16.xpose.msk.msra.mxu0 %vm4601_vm4, %v4173_v19  ;;  %v725_v26 = vmul.f32 %v4414_v24, %v4637_v53 }
 0x617   :  { %4162 = vmatpush3.bf16.msra.mxu1 %v4159_v18  ;;  %3883 = vmatprep.mubr.msk.f32.mxu1 %vm42_vm0, %v723_v25  ;;  %v3576_v25 = vld [vmem:[#allocation2 + $0x110] ss:$0 sm:$0xff] }
 0x618   :  { %3886 = vmatprep.subr.mxu1 %v411_v38 }
 0x61a   :  { %3884 = vmatmul.mubr.msk.f32.vlgmr.msra.gmra.mrb[6].mxu1 %vm42_vm0, %v725_v26 }
 0x61b   :  { %3887 = vmatpush3.msra.mxu1 %v411_v38 }
 0x61c   :  { %3891 = vmatprep.subr.mxu1 %v410_v39 }
 0x61d   :  { %3920 = vmatmul.mubr.msk.f32.vlgmr.msra.gmra.mrb[10].mxu0 %vm420_vm3, %v1261_v27 }
 0x642   :  { %v1068_v28 = vpop.xlane.xlu0 %1067 }
 0x643   :  { %v1072_v29 = vsub.f32 %v1058_v57, %v1068_v28 }
 0x645   :  { %v1074_v30 = vmul.f32 1.442695, %v1072_v29  ;;  %v1071_v31 = vpop.xlane.xlu1 %1070 }
 0x646   :  { %v1073_v32 = vsub.f32 %v1063_v58, %v1071_v31  ;;  %v412_v58 = vld [vmem:[#allocation2 + $0x100] sm:$0xff] }
 0x647   :  { %4415 = vpow2.f32 %v1074_v30 }
 0x648   :  { %v1076_v33 = vmul.f32 1.442695, %v1073_v32 }
 0x649   :  { %v4351_v41 = vpop.permute.xlu1 %4350 }
 0x64a   :  { %4417 = vpow2.f32 %v1076_v33  ;;  %v4353_v45 = vunpack.i.h.bf16 %v4351_v41  ;;  %v4352_v46 = vunpack.i.l.bf16 %v4351_v41 }
 0x64c   :  { %v4169_v49 = vpack.c.bf16 %v4353_v45, %v4352_v46  ;;  %v1593_v45 = vld [vmem:[#allocation2 + $0x138] sm:$0xff]  ;;  %v1594_v46 = vld [vmem:[#allocation2 + $0x140] sm:$0xff] }
 0x64d   :  { %v4356_v56 = vpop.permute.xlu1 %4355 }
 0x64e   :  { %v4358_v59 = vunpack.i.h.bf16 %v4356_v56  ;;  %v4357_v62 = vunpack.i.l.bf16 %v4356_v56 }
 0x651   :  { %v4416_v34 = vpop.eup %4415 }
 0x652   :  { %v1078_v35 = vsel %vm42_vm0, %v4416_v34, 0.0 }
 0x653   :  { %1079 = vadd.xlane.f32.xlu0 %v1078_v35 }
 0x654   :  { %v4418_v36 = vpop.eup %4417 }
 0x655   :  { %v1081_v37 = vsel %vm42_vm0, %v4418_v36, 0.0 }
 0x657   :  { %1082 = vadd.xlane.f32.xlu0 %v1081_v37 }
 0x6e0   :  { %v1080_v40 = vpop.xlane.xlu0 %1079 }
 0x6e1   :  { %4419 = vrcp.f32 %v1080_v40 }
 0x6e4   :  { %v1083_v43 = vpop.xlane.xlu0 %1082 }
 0x6e5   :  { %4421 = vrcp.f32 %v1083_v43  ;;  %v1592_v43 = vld [vmem:[#allocation2 + $0x130] sm:$0xff] }
 0x6e9   :  { %v3871_v42 = vpop.f32.mrb[4].mxu1 }
 0x6ea   :  { %v604_v44 = vpop.f32.mrb[5].mxu1 }
 0x6eb   :  { %v4420_v55 = vpop.eup %4419 }
 0x6ec   :  { %v1085_v0 = vmul.f32 %v4420_v55, %v4416_v34  ;;  %v3577_v55 = vld [vmem:[#allocation2 + $0x118] ss:$0 sm:$0xff] }
 0x6ed   :  { %v3885_v47 = vpop.f32.mrb[6].mxu1 }
 0x6ee   :  { %v804_v48 = vpop.f32.mrb[7].mxu1 }
 0x6ef   :  { %3888 = vmatprep.mubr.msk.f32.mxu1 %vm420_vm3, %v804_v48  ;;  %v4422_v57 = vpop.eup %4421 }
 0x6f0   :  { %3889 = vmatmul.mubr.msk.f32.vlgmr.msra.gmra.mrb[8].mxu1 %vm420_vm3, %v3885_v47  ;;  %v3921_v50 = vpop.f32.mrb[10].mxu0  ;;  %v1087_v1 = vmul.f32 %v4422_v57, %v4418_v36  ;;  %v4187_v47 = vpack.c.bf16 %v1594_v46, %v1593_v45  ;;  %v3578_v57 = vld [vmem:[#allocation2 + $0x120] ss:$0 sm:$0xff] }
 0x6f1   :  { %3892 = vmatpush3.msra.mxu1 %v410_v39  ;;  %3893 = vmatprep.mubr.msk.f32.mxu1 %vm420_vm3, %v604_v44  ;;  %v1340_v51 = vpop.f32.mrb[11].mxu0  ;;  %v1346_v53 = vadd.f32 %v3921_v50, %v4623_v21  ;;  %v4179_v21 = vpack.c.bf16 %v4358_v59, %v4357_v62 }
 0x6f2   :  { %4170 = vmatprep.subr.bf16.mxu1 %v4169_v49  ;;  %v1341_v52 = vadd.f32 %v1340_v51, %v4625_v22 }
 0x6f3   :  { %v1352_v63 = vsel %vm42_vm0, %v1346_v53, -inf }
 0x6f4   :  { %v1349_v54 = vsel %vm42_vm0, %v1341_v52, -inf }
 0x6f5   :  { %1350 = vmax.xlane.f32.xlu0 %v1349_v54 }
 0x6f8   :  { %3894 = vmatmul.mubr.msk.f32.vlgmr.msra.gmra.mrb[8].mxu1 %vm420_vm3, %v3871_v42 }
 0x6f9   :  { %4172 = vmatpush3.bf16.msra.mxu1 %v4169_v49  ;;  %1353 = vmax.xlane.f32.xlu0 %v1352_v63 }
 0x6fa   :  { %3907 = vmatprep.mubr.msk.f32.mxu1 %vm42_vm0, %v1085_v0  ;;  %3910 = vmatprep.subr.mxu1 %v412_v58 }
 0x6fc   :  { %3908 = vmatmul.mubr.msk.f32.vlgmr.msra.gmra.mrb[10].mxu1 %vm42_vm0, %v1087_v1 }
 0x6fd   :  { %3911 = vmatpush3.msra.mxu1 %v412_v58 }
 0x6fe   :  { %4180 = vmatprep.subr.bf16.mxu1 %v4179_v21 }
 0x782   :  { %v1351_v22 = vpop.xlane.xlu0 %1350 }
 0x783   :  { %v1355_v2 = vsub.f32 %v1341_v52, %v1351_v22  ;;  %v1700_v22 = vld [vmem:[#allocation2 + $0x158] sm:$0xff] }
 0x785   :  { %v1357_v4 = vmul.f32 1.442695, %v1355_v2 }
 0x786   :  { %v1354_v5 = vpop.xlane.xlu0 %1353 }
 0x787   :  { %4423 = vpow2.f32 %v1357_v4  ;;  %v1356_v6 = vsub.f32 %v1346_v53, %v1354_v5  ;;  %v1701_v4 = vld [vmem:[#allocation2 + $0x160] sm:$0xff]  ;;  %v1702_v5 = vld [vmem:[#allocation2 + $0x168] sm:$0xff] }
 0x789   :  { %v1359_v8 = vmul.f32 1.442695, %v1356_v6  ;;  %v4195_v6 = vpack.c.bf16 %v1702_v5, %v1701_v4  ;;  %v3585_v5 = vld [vmem:[#allocation2 + $0x198] ss:$0 sm:$0xff] }
 0x78b   :  { %4425 = vpow2.f32 %v1359_v8  ;;  %v1703_v8 = vld [vmem:[#allocation2 + $0x170] sm:$0xff] }
 0x791   :  { %v4424_v9 = vpop.eup %4423 }
 0x792   :  { %v1361_v10 = vsel %vm42_vm0, %v4424_v9, 0.0 }
 0x793   :  { %1362 = vadd.xlane.f32.xlu0 %v1361_v10 }
 0x795   :  { %v4426_v11 = vpop.eup %4425 }
 0x796   :  { %v1364_v12 = vsel %vm42_vm0, %v4426_v11, 0.0 }
 0x797   :  { %1365 = vadd.xlane.f32.xlu0 %v1364_v12  ;;  %v1706_v12 = vld [vmem:[#allocation2 + $0x188] sm:$0xff] }
 0x7cf   :  { %v3909_v13 = vpop.f32.mrb[10].mxu1 }
 0x7d0   :  { %v1166_v3 = vpop.f32.mrb[11].mxu1 }
 0x7d1   :  { %3912 = vmatprep.mubr.msk.f32.mxu1 %vm420_vm3, %v1166_v3  ;;  %v3579_v3 = vld [vmem:[#allocation2 + $0x148] ss:$0 sm:$0xff] }
 0x7d2   :  { %3913 = vmatmul.mubr.msk.f32.vlgmr.msra.gmra.mrb[8].mxu1 %vm420_vm3, %v3909_v13 }
 0x7d3   :  { %4182 = vmatpush3.bf16.msra.mxu1 %v4179_v21  ;;  %v1699_v21 = vld [vmem:[#allocation2 + $0x150] sm:$0xff] }
 0x7d4   :  { %3929 = vmatprep.subr.mxu1 %v413_v14  ;;  %v4191_v2 = vpack.c.bf16 %v1700_v22, %v1699_v21 }
 0x820   :  { %v1363_v15 = vpop.xlane.xlu0 %1362 }
 0x821   :  { %4427 = vrcp.f32 %v1363_v15 }
 0x824   :  { %v1366_v16 = vpop.xlane.xlu0 %1365 }
 0x825   :  { %4429 = vrcp.f32 %v1366_v16 }
 0x82b   :  { %v4428_v17 = vpop.eup %4427 }
 0x82c   :  { %v1368_v18 = vmul.f32 %v4428_v17, %v4424_v9  ;;  %v1704_v9 = vld [vmem:[#allocation2 + $0x178] sm:$0xff] }
 0x82d   :  { %v4199_v10 = vpack.c.bf16 %v1704_v9, %v1703_v8  ;;  %v3586_v8 = vld [vmem:[#allocation2 + $0x1a0] ss:$0 sm:$0xff] }
 0x82e   :  { %3926 = vmatprep.mubr.msk.f32.mxu1 %vm42_vm0, %v1368_v18 }
 0x82f   :  { %v4430_v19 = vpop.eup %4429 }
 0x830   :  { %v1370_v20 = vmul.f32 %v4430_v19, %v4426_v11  ;;  %v1705_v11 = vld [vmem:[#allocation2 + $0x180] sm:$0xff] }
 0x831   :  { %v4203_v13 = vpack.c.bf16 %v1706_v12, %v1705_v11  ;;  %v1835_v11 = vld [vmem:[#allocation2 + $0x2b8] sm:$0xff] }
 0x832   :  { %3927 = vmatmul.mubr.msk.f32.vlgmr.msra.gmra.mrb[12].mxu1 %vm42_vm0, %v1370_v20 }
 0x833   :  { %3930 = vmatpush3.msra.mxu1 %v413_v14 }
 0x834   :  { %4192 = vmatprep.subr.bf16.mxu1 %v4191_v2 }
 0x905   :  { %v3928_v23 = vpop.f32.mrb[12].mxu1 }
 0x906   :  { %v1449_v24 = vpop.f32.mrb[13].mxu1 }
 0x907   :  { %3931 = vmatprep.mubr.msk.f32.mxu1 %vm420_vm3, %v1449_v24 }
 0x908   :  { %3932 = vmatmul.mubr.msk.f32.vlgmr.msra.gmra.mrb[8].mxu1 %vm420_vm3, %v3928_v23 }
 0x909   :  { %4194 = vmatpush3.bf16.msra.mxu1 %v4191_v2 }
 0x90a   :  { %4196 = vmatprep.subr.bf16.mxu1 %v4195_v6 }
 0x90d   :  { %4198 = vmatpush3.bf16.msra.mxu1 %v4195_v6 }
 0x90e   :  { %4200 = vmatprep.subr.bf16.mxu1 %v4199_v10 }
 0x911   :  { %4202 = vmatpush3.bf16.msra.mxu1 %v4199_v10 }
 0x912   :  { %4204 = vmatprep.subr.bf16.mxu1 %v4203_v13 }
 0x915   :  { %4206 = vmatpush3.bf16.msra.mxu1 %v4203_v13 }
 0x9db   :  { %v3933_v26 = vpop.f32.mrb[8].mxu1 }
 0x9dc   :  { %v1547_v27 = vadd.f32 %v3933_v26, %v3576_v25  ;;  %v1530_v28 = vpop.f32.mrb[9].mxu1 }
 0x9dd   :  { %v1546_v29 = vadd.f32 %v3576_v25, %v1530_v28 }
 0x9de   :  { %v1549_v30 = vadd.f32 %v1547_v27, %v4569_v61 }
 0x9df   :  { %v1548_v31 = vadd.f32 %v1546_v29, %v4567_v60  ;;  %v1591_v60 = vld [vmem:[#allocation2 + $0x128] sm:$0xff] }
 0x9e0   :  { %v1553_v32 = vsel %vm326_vm2, %v1549_v30, 0.0  ;;  %v4183_v44 = vpack.c.bf16 %v1592_v43, %v1591_v60 }
 0x9e1   :  { %1554 = vadd.xlane.f32.xlu1 %v1553_v32  ;;  %v1550_v33 = vsel %vm326_vm2, %v1548_v31, 0.0 }
 0x9e2   :  { %1551 = vadd.xlane.f32.xlu0 %v1550_v33  ;;  %4184 = vmatprep.subr.bf16.mxu0 %v4183_v44 }
 0x9e3   :  { %4186 = vmatpush3.bf16.msra.mxu0 %v4183_v44 }
 0x9e4   :  { %4188 = vmatprep.subr.bf16.mxu0 %v4187_v47 }
 0x9e7   :  { %4190 = vmatpush3.bf16.msra.mxu0 %v4187_v47 }
 0xa6e   :  { %v1555_v34 = vpop.xlane.xlu1 %1554 }
 0xa6f   :  { %v1558_v35 = vmul.f32 0.03125, %v1555_v34  ;;  %v1552_v36 = vpop.xlane.xlu0 %1551 }
 0xa70   :  { %v1557_v37 = vmul.f32 0.03125, %v1552_v36 }
 0xa71   :  { %v1560_v38 = vsub.f32 %v1549_v30, %v1558_v35 }
 0xa72   :  { %v1559_v39 = vsub.f32 %v1548_v31, %v1557_v37 }
 0xa73   :  { %v1562_v42 = vmul.f32 %v1560_v38, %v1560_v38 }
 0xa74   :  { %v1561_v40 = vmul.f32 %v1559_v39, %v1559_v39 }
 0xa75   :  { %v1566_v61 = vsel %vm326_vm2, %v1562_v42, 0.0 }
 0xa76   :  { %v1563_v41 = vsel %vm326_vm2, %v1561_v40, 0.0 }
 0xa77   :  { %1564 = vadd.xlane.f32.xlu0 %v1563_v41 }
 0xa7b   :  { %1567 = vadd.xlane.f32.xlu0 %v1566_v61 }
 0xb04   :  { %v1565_v48 = vpop.xlane.xlu0 %1564 }
 0xb05   :  { %v1569_v49 = vmul.f32 0.03125, %v1565_v48 }
 0xb07   :  { %v1571_v50 = vadd.f32 1e-05, %v1569_v49 }
 0xb08   :  { %v1568_v51 = vpop.xlane.xlu0 %1567 }
 0xb09   :  { %4431 = vrsqrt.f32 %v1571_v50  ;;  %v1570_v52 = vmul.f32 0.03125, %v1568_v51 }
 0xb0b   :  { %v1572_v53 = vadd.f32 1e-05, %v1570_v52 }
 0xb0d   :  { %4433 = vrsqrt.f32 %v1572_v53 }
 0xb13   :  { %v4432_v54 = vpop.eup %4431 }
 0xb14   :  { %v1575_v56 = vmul.f32 %v4432_v54, %v1559_v39 }
 0xb16   :  { %v1582_v58 = vmul.f32 %v3577_v55, %v1575_v56  ;;  %v1844_v56 = vld [vmem:[#allocation2 + $0x1b0] sm:$0xff] }
 0xb17   :  { %v4434_v59 = vpop.eup %4433 }
 0xb18   :  { %v1576_v62 = vmul.f32 %v4434_v59, %v1560_v38  ;;  %v1589_v63 = vadd.f32 %v3578_v57, %v1582_v58  ;;  %v3582_v38 = vld [vmem:[#allocation2 + $0x190] ss:$0 sm:$0xff]  ;;  %v1845_v58 = vld [vmem:[#allocation2 + $0x1b8] sm:$0xff]  ;;  %v1846_v59 = vld [vmem:[#allocation2 + $0x1c0] sm:$0xff] }
 0xb1a   :  { %v1583_v0 = vmul.f32 %v3577_v55, %v1576_v62  ;;  %3942 = vmatprep.mubr.msk.f32.mxu0 %vm326_vm2, %v1589_v63  ;;  %v1843_v55 = vld [vmem:[#allocation2 + $0x1a8] sm:$0xff]  ;;  %v4211_v62 = vpack.c.bf16 %v1846_v59, %v1845_v58 }
 0xb1c   :  { %v1590_v1 = vadd.f32 %v3578_v57, %v1583_v0  ;;  %v4207_v57 = vpack.c.bf16 %v1844_v56, %v1843_v55 }
 0xb1e   :  { %3943 = vmatmul.mubr.msk.f32.vlgmr.msra.gmra.mrb[12].mxu0 %vm326_vm2, %v1590_v1  ;;  %4208 = vmatprep.subr.bf16.mxu0 %v4207_v57 }
 0xb1f   :  { %4210 = vmatpush3.bf16.msra.mxu0 %v4207_v57 }
 0xb20   :  { %4212 = vmatprep.subr.bf16.mxu0 %v4211_v62 }
 0xb23   :  { %4214 = vmatpush3.bf16.msra.mxu0 %v4211_v62 }
 0xbf1   :  { %v3944_v14 = vpop.f32.mrb[12].mxu0 }
 0xbf2   :  { %v1678_v15 = vadd.f32 %v3944_v14, %v3579_v3  ;;  %v1672_v16 = vpop.f32.mrb[13].mxu0 }
 0xbf3   :  { %v1673_v17 = vadd.f32 %v3579_v3, %v1672_v16  ;;  %v1839_v3 = vld [vmem:[#allocation2 + $0x2a8] sm:$0xff]  ;;  %v1836_v16 = vld [vmem:[#allocation2 + $0x2c0] sm:$0xff] }
 0xbf4   :  { %v1682_v18 = vmul.f32 %v1678_v15, %v1678_v15 }
 0xbf5   :  { %v1681_v19 = vmul.f32 %v1673_v17, %v1673_v17 }
 0xbf6   :  { %v1684_v20 = vmul.f32 %v1682_v18, %v1678_v15 }
 0xbf7   :  { %v1683_v23 = vmul.f32 %v1681_v19, %v1673_v17  ;;  %v1840_v19 = vld [vmem:[#allocation2 + $0x2b0] sm:$0xff] }
 0xbf8   :  { %v1686_v24 = vmul.f32 0.044715, %v1684_v20 }
 0xbf9   :  { %v1685_v25 = vmul.f32 0.044715, %v1683_v23 }
 0xbfa   :  { %v1688_v26 = vadd.f32 %v1686_v24, %v1678_v15  ;;  %v3587_v24 = vld [vmem:[#allocation2 + $0x1c8] ss:$0 sm:$0xff] }
 0xbfb   :  { %v1687_v27 = vadd.f32 %v1685_v25, %v1673_v17 }
 0xbfc   :  { %v1690_v28 = vmul.f32 0.7978846, %v1688_v26 }
 0xbfd   :  { %v1689_v29 = vmul.f32 0.7978846, %v1687_v27 }
 0xbfe   :  { %4435 = vtanh.f32 %v1690_v28 }
 0xbff   :  { %4437 = vtanh.f32 %v1689_v29 }
 0xc08   :  { %v4436_v30 = vpop.eup %4435 }
 0xc09   :  { %v4438_v31 = vpop.eup %4437  ;;  %v1694_v32 = vadd.f32 1.0, %v4436_v30 }
 0xc0a   :  { %v1693_v33 = vadd.f32 1.0, %v4438_v31 }
 0xc0b   :  { %v1696_v34 = vmul.f32 0.5, %v1694_v32 }
 0xc0c   :  { %v1695_v35 = vmul.f32 0.5, %v1693_v33 }
 0xc0d   :  { %v1698_v37 = vmul.f32 %v1696_v34, %v1678_v15 }
 0xc0e   :  { %v1697_v36 = vmul.f32 %v1695_v35, %v1673_v17 }
 0xc10   :  { %3961 = vmatprep.mubr.msk.f32.mxu1 %vm139_vm1, %v1697_v36 }
 0xc11   :  { %3962 = vmatmul.mubr.msk.f32.vlgmr.msra.gmra.mrb[14].mxu1 %vm139_vm1, %v1698_v37 }
 0xce4   :  { %v3963_v39 = vpop.f32.mrb[14].mxu1 }
 0xce5   :  { %v1784_v40 = vpop.f32.mrb[15].mxu1  ;;  %v1790_v41 = vadd.f32 %v3963_v39, %v3582_v38 }
 0xce6   :  { %v1785_v42 = vadd.f32 %v3582_v38, %v1784_v40 }
 0xce7   :  { %v1794_v43 = vadd.f32 %v1790_v41, %v1590_v1 }
 0xce8   :  { %v1793_v61 = vadd.f32 %v1785_v42, %v1589_v63 }
 0xce9   :  { %v1798_v44 = vsel %vm326_vm2, %v1794_v43, 0.0 }
 0xcea   :  { %v1795_v60 = vsel %vm326_vm2, %v1793_v61, 0.0 }
 0xceb   :  { %1796 = vadd.xlane.f32.xlu0 %v1795_v60 }
 0xcef   :  { %1799 = vadd.xlane.f32.xlu0 %v1798_v44  ;;  %v4755_v44 = vld [vmem:[#allocation2 + $0x2a0] sm:$0xff] }
 0xd78   :  { %v1797_v45 = vpop.xlane.xlu0 %1796 }
 0xd79   :  { %v1801_v46 = vmul.f32 0.03125, %v1797_v45  ;;  %v4757_v45 = vld [vmem:[#allocation2 + $0x298] sm:$0xff] }
 0xd7b   :  { %v1803_v47 = vsub.f32 %v1793_v61, %v1801_v46 }
 0xd7c   :  { %v1800_v48 = vpop.xlane.xlu0 %1799 }
 0xd7d   :  { %v1802_v49 = vmul.f32 0.03125, %v1800_v48  ;;  %v1805_v50 = vmul.f32 %v1803_v47, %v1803_v47 }
 0xd7f   :  { %v1804_v51 = vsub.f32 %v1794_v43, %v1802_v49  ;;  %v1807_v52 = vsel %vm326_vm2, %v1805_v50, 0.0 }
 0xd80   :  { %1808 = vadd.xlane.f32.xlu0 %v1807_v52 }
 0xd81   :  { %v1806_v53 = vmul.f32 %v1804_v51, %v1804_v51 }
 0xd83   :  { %v1810_v54 = vsel %vm326_vm2, %v1806_v53, 0.0 }
 0xd84   :  { %1811 = vadd.xlane.f32.xlu0 %v1810_v54 }
 0xe0d   :  { %v1809_v63 = vpop.xlane.xlu0 %1808 }
 0xe0e   :  { %v1813_v0 = vmul.f32 0.03125, %v1809_v63 }
 0xe10   :  { %v1815_v1 = vadd.f32 1e-05, %v1813_v0 }
 0xe11   :  { %v1812_v21 = vpop.xlane.xlu0 %1811 }
 0xe12   :  { %4439 = vrsqrt.f32 %v1815_v1  ;;  %v1814_v22 = vmul.f32 0.03125, %v1812_v21 }
 0xe14   :  { %v1816_v2 = vadd.f32 1e-05, %v1814_v22 }
 0xe16   :  { %4441 = vrsqrt.f32 %v1816_v2 }
 0xe1c   :  { %v4440_v4 = vpop.eup %4439 }
 0xe1d   :  { %v1819_v6 = vmul.f32 %v4440_v4, %v1803_v47 }
 0xe1f   :  { %v1826_v9 = vmul.f32 %v3585_v5, %v1819_v6 }
 0xe20   :  { %v4442_v10 = vpop.eup %4441 }
 0xe21   :  { %v1820_v12 = vmul.f32 %v4442_v10, %v1804_v51  ;;  %v1833_v13 = vadd.f32 %v3586_v8, %v1826_v9 }
 0xe23   :  { %v1827_v14 = vmul.f32 %v3585_v5, %v1820_v12  ;;  %v1837_v15 = vmul.f32 %v1835_v11, %v1833_v13 }
 0xe25   :  { %v1834_v17 = vadd.f32 %v3586_v8, %v1827_v14  ;;  %v4705_v18 = vadd.f32 %v1839_v3, %v1837_v15 }
 0xe27   :  { %3972 = vmatprep.mubr.msk.f32.mxu0 %vm326_vm2, %v4705_v18  ;;  %v1838_v20 = vmul.f32 %v1836_v16, %v1834_v17 }
 0xe29   :  { %v4709_v23 = vadd.f32 %v1840_v19, %v1838_v20 }
 0xe2b   :  { %3973 = vmatmul.mubr.msk.f32.vlgmr.msra.gmra.mrb[14].mxu0 %vm326_vm2, %v4709_v23 }
 0xefe   :  { %v3974_v25 = vpop.f32.mrb[14].mxu0 }
 0xeff   :  { %v4713_v26 = vadd.f32 %v3974_v25, %v3587_v24  ;;  %v1924_v27 = vpop.f32.mrb[15].mxu0 }
 0xf00   :  { %v4715_v28 = vadd.f32 %v3587_v24, %v1924_v27 }
 0xf02   :  { %3979 = vmatprep.mubr.msk.f32.mxu0 %vm420_vm3, %v4715_v28  ;;  %v4721_v29 = vpack.i.bf16 %v4713_v26, %v4715_v28 }
 0xf04   :  { %4365 = vrot.lane.b32.xlu1 %v4721_v29, %s4516_s27  ;;  %4360 = vrot.lane.b32.xlu0 %v4721_v29, %s4515_s1 }
 0xf08   :  { %4370 = vrot.lane.b32.xlu1 %v4721_v29, %s4518_s29  ;;  %2137 = vrot.lane.b32.xlu0 %v4715_v28, %s4514_s0 }
 0xf0c   :  { %2501 = vrot.lane.b32.xlu1 %v4713_v26, %s4517_s28  ;;  %2139 = vrot.lane.b32.xlu0 %v4713_v26, %s4514_s0 }
 0xf10   :  { %2499 = vrot.lane.b32.xlu0 %v4715_v28, %s4517_s28 }
 0xf76   :  { %v4366_v30 = vpop.permute.xlu1 %4365  ;;  %v4361_v31 = vpop.permute.xlu0 %4360 }
 0xf77   :  { %v4368_v32 = vunpack.i.h.bf16 %v4366_v30  ;;  %v4367_v33 = vunpack.i.l.bf16 %v4366_v30  ;;  %v4363_v34 = vunpack.i.h.bf16 %v4361_v31  ;;  %v4362_v35 = vunpack.i.l.bf16 %v4361_v31 }
 0xf79   :  { %v4215_v36 = vpack.c.bf16 %v4363_v34, %v4362_v35  ;;  %v4225_v37 = vpack.c.bf16 %v4368_v32, %v4367_v33 }
 0xf7a   :  { %v4371_v38 = vpop.permute.xlu1 %4370  ;;  %v2138_v41 = vpop.permute.xlu0 %2137 }
 0xf7b   :  { %4217 = vmatprep.subr.msk.bf16.mxu0 %vm4601_vm4, %v4215_v36  ;;  %v4373_v39 = vunpack.i.h.bf16 %v4371_v38  ;;  %v4372_v40 = vunpack.i.l.bf16 %v4371_v38 }
 0xf7c   :  { %4220 = vmatpush3.bf16.xpose.msk.msra.mxu0 %vm4601_vm4, %v4215_v36 }
 0xf7d   :  { %4227 = vmatprep.subr.msk.bf16.mxu0 %vm4601_vm4, %v4225_v37  ;;  %v4235_v42 = vpack.c.bf16 %v4373_v39, %v4372_v40 }
 0xf7e   :  { %v2140_v61 = vpop.permute.xlu0 %2139  ;;  %v2502_v43 = vpop.permute.xlu1 %2501 }
 0xf82   :  { %v2500_v60 = vpop.permute.xlu0 %2499 }
 0xf83   :  { %3980 = vmatmul.mubr.msk.f32.vlgmr.msra.gmra.mrb[16].mxu0 %vm420_vm3, %v4713_v26 }
 0xf84   :  { %4230 = vmatpush3.bf16.xpose.msk.msra.mxu0 %vm4601_vm4, %v4225_v37  ;;  %3993 = vmatprep.mubr.msk.f32.mxu0 %vm420_vm3, %v2138_v41 }
 0xf85   :  { %4237 = vmatprep.subr.msk.bf16.mxu0 %vm4601_vm4, %v4235_v42 }
 0xf8b   :  { %3994 = vmatmul.mubr.msk.f32.vlgmr.msra.gmra.mrb[18].mxu0 %vm420_vm3, %v2140_v61 }
 0xf8c   :  { %4240 = vmatpush3.bf16.xpose.msk.msra.mxu0 %vm4601_vm4, %v4235_v42  ;;  %4017 = vmatprep.mubr.msk.f32.mxu0 %vm420_vm3, %v2500_v60 }
 0xf93   :  { %4018 = vmatmul.mubr.msk.f32.vlgmr.msra.gmra.mrb[20].mxu0 %vm420_vm3, %v2502_v43 }
0x1056   :  { %v3981_v46 = vpop.f32.mrb[16].mxu0 }
0x1057   :  { %v2025_v47 = vadd.f32 %v3981_v46, %v4755_v44  ;;  %v2019_v48 = vpop.f32.mrb[17].mxu0 }
0x1058   :  { %v2020_v49 = vadd.f32 %v2019_v48, %v4757_v45 }
0x1059   :  { %v2031_v50 = vsel %vm42_vm0, %v2025_v47, -inf }
0x105a   :  { %2032 = vmax.xlane.f32.xlu1 %v2031_v50  ;;  %v2028_v51 = vsel %vm42_vm0, %v2020_v49, -inf }
0x105b   :  { %2029 = vmax.xlane.f32.xlu0 %v2028_v51 }
0x105e   :  { %v3995_v52 = vpop.f32.mrb[18].mxu0 }
0x105f   :  { %v2219_v53 = vpop.f32.mrb[19].mxu0  ;;  %v2225_v55 = vadd.f32 %v3995_v52, %v4755_v44 }
0x1060   :  { %v2220_v54 = vadd.f32 %v2219_v53, %v4757_v45 }
0x1061   :  { %v2231_v58 = vsel %vm42_vm0, %v2225_v55, -inf }
0x1062   :  { %v2228_v56 = vsel %vm42_vm0, %v2220_v54, -inf }
0x1063   :  { %2229 = vmax.xlane.f32.xlu0 %v2228_v56 }
0x1066   :  { %v4019_v57 = vpop.f32.mrb[20].mxu0 }
0x1067   :  { %v2581_v59 = vpop.f32.mrb[21].mxu0  ;;  %2232 = vmax.xlane.f32.xlu0 %v2231_v58  ;;  %v2587_v17 = vadd.f32 %v4019_v57, %v4755_v44 }
0x1068   :  { %v2582_v19 = vadd.f32 %v2581_v59, %v4757_v45 }
0x1069   :  { %v2593_v24 = vsel %vm42_vm0, %v2587_v17, -inf }
0x106a   :  { %v2590_v20 = vsel %vm42_vm0, %v2582_v19, -inf }
0x10e7   :  { %v2033_v62 = vpop.xlane.xlu1 %2032 }
0x10e8   :  { %v2035_v63 = vsub.f32 %v2025_v47, %v2033_v62  ;;  %v2030_v0 = vpop.xlane.xlu0 %2029 }
0x10e9   :  { %v2034_v1 = vsub.f32 %v2020_v49, %v2030_v0  ;;  %v1935_v0 = vld [vmem:[#allocation2 + $0x1d0] sm:$0xff] }
0x10ea   :  { %v2038_v21 = vmul.f32 1.442695, %v2035_v63  ;;  %v1936_v63 = vld [vmem:[#allocation2 + $0x1d8] sm:$0xff] }
0x10eb   :  { %v2036_v22 = vmul.f32 1.442695, %v2034_v1 }
0x10ec   :  { %4443 = vpow2.f32 %v2038_v21 }
0x10ed   :  { %4445 = vpow2.f32 %v2036_v22 }
0x10f0   :  { %v2230_v2 = vpop.xlane.xlu0 %2229 }
0x10f1   :  { %v2234_v4 = vsub.f32 %v2220_v54, %v2230_v2 }
0x10f3   :  { %v2236_v5 = vmul.f32 1.442695, %v2234_v4 }
0x10f4   :  { %v2233_v6 = vpop.xlane.xlu0 %2232 }
0x10f5   :  { %4447 = vpow2.f32 %v2236_v5  ;;  %v2235_v8 = vsub.f32 %v2225_v55, %v2233_v6 }
0x10f6   :  { %v4444_v9 = vpop.eup %4443 }
0x10f7   :  { %v4446_v10 = vpop.eup %4445  ;;  %v2238_v11 = vmul.f32 1.442695, %v2235_v8  ;;  %v2043_v12 = vsel %vm42_vm0, %v4444_v9, 0.0 }
0x10f8   :  { %2044 = vadd.xlane.f32.xlu0 %v2043_v12  ;;  %v2040_v13 = vsel %vm42_vm0, %v4446_v10, 0.0 }
0x10f9   :  { %4449 = vpow2.f32 %v2238_v11  ;;  %2041 = vadd.xlane.f32.xlu1 %v2040_v13 }
0x10ff   :  { %v4448_v3 = vpop.eup %4447 }
0x1100   :  { %v2240_v14 = vsel %vm42_vm0, %v4448_v3, 0.0 }
0x1101   :  { %2241 = vadd.xlane.f32.xlu1 %v2240_v14 }
0x1103   :  { %v4450_v15 = vpop.eup %4449 }
0x1104   :  { %v2243_v16 = vsel %vm42_vm0, %v4450_v15, 0.0 }
0x1105   :  { %2244 = vadd.xlane.f32.xlu0 %v2243_v16 }
0x1112   :  { %4375 = vrot.lane.b32.xlu1 %v4721_v29, %s4521_s4 }
0x1116   :  { %4385 = vrot.lane.b32.xlu1 %v4721_v29, %s4520_s3 }
0x111a   :  { %2782 = vrot.lane.b32.xlu1 %v4715_v28, %s4522_s5 }
0x111b   :  { %4380 = vrot.lane.b32.xlu0 %v4721_v29, %s4519_s30 }
0x111f   :  { %2784 = vrot.lane.b32.xlu0 %v4713_v26, %s4522_s5 }
0x113e   :  { %2591 = vmax.xlane.f32.xlu1 %v2590_v20  ;;  %2594 = vmax.xlane.f32.xlu0 %v2593_v24  ;;  %v1937_v24 = vld [vmem:[#allocation2 + $0x1e0] sm:$0xff] }
0x1185   :  { %v2045_v27 = vpop.xlane.xlu0 %2044 }
0x1186   :  { %v2042_v25 = vpop.xlane.xlu1 %2041 }
0x1187   :  { %4451 = vrcp.f32 %v2042_v25 }
0x1188   :  { %4453 = vrcp.f32 %v2045_v27 }
0x118e   :  { %v2242_v28 = vpop.xlane.xlu1 %2241 }
0x118f   :  { %4455 = vrcp.f32 %v2242_v28 }
0x1191   :  { %v4452_v30 = vpop.eup %4451 }
0x1192   :  { %v4376_v31 = vpop.permute.xlu1 %4375  ;;  %v2245_v32 = vpop.xlane.xlu0 %2244  ;;  %v2047_v26 = vmul.f32 %v4452_v30, %v4446_v10 }
0x1193   :  { %v4378_v33 = vunpack.i.h.bf16 %v4376_v31  ;;  %v4377_v34 = vunpack.i.l.bf16 %v4376_v31  ;;  %4457 = vrcp.f32 %v2245_v32  ;;  %v4454_v36 = vpop.eup %4453 }
0x1194   :  { %3986 = vmatprep.mubr.msk.f32.mxu1 %vm42_vm0, %v2047_v26  ;;  %v2049_v60 = vmul.f32 %v4454_v36, %v4444_v9 }
0x1195   :  { %v4221_v35 = vpack.c.bf16 %v4378_v33, %v4377_v34 }
0x1196   :  { %v4386_v37 = vpop.permute.xlu1 %4385  ;;  %v4381_v38 = vpop.permute.xlu0 %4380 }
0x1197   :  { %v4388_v39 = vunpack.i.h.bf16 %v4386_v37  ;;  %v4387_v40 = vunpack.i.l.bf16 %v4386_v37  ;;  %v4383_v41 = vunpack.i.h.bf16 %v4381_v38  ;;  %v4382_v42 = vunpack.i.l.bf16 %v4381_v38  ;;  %4222 = vmatprep.subr.bf16.mxu1 %v4221_v35 }
0x1198   :  { %4224 = vmatpush3.bf16.msra.mxu1 %v4221_v35 }
0x1199   :  { %v4456_v61 = vpop.eup %4455  ;;  %v4245_v43 = vpack.c.bf16 %v4388_v39, %v4387_v40  ;;  %v4231_v46 = vpack.c.bf16 %v4383_v41, %v4382_v42  ;;  %v1938_v42 = vld [vmem:[#allocation2 + $0x1e8] sm:$0xff] }
0x119a   :  { %v2783_v47 = vpop.permute.xlu1 %2782  ;;  %v2247_v48 = vmul.f32 %v4456_v61, %v4448_v3  ;;  %v2785_v51 = vpop.permute.xlu0 %2784 }
0x119b   :  { %3987 = vmatmul.mubr.msk.f32.vlgmr.msra.gmra.mrb[16].mxu1 %vm42_vm0, %v2049_v60  ;;  %4232 = vmatprep.subr.bf16.mxu1 %v4231_v46 }
0x119c   :  { %4247 = vmatprep.subr.msk.bf16.mxu0 %vm4601_vm4, %v4245_v43  ;;  %4036 = vmatprep.mubr.msk.f32.mxu0 %vm420_vm3, %v2783_v47 }
0x119d   :  { %v4458_v49 = vpop.eup %4457  ;;  %4234 = vmatpush3.bf16.msra.mxu1 %v4231_v46  ;;  %4000 = vmatprep.mubr.msk.f32.mxu1 %vm42_vm0, %v2247_v48  ;;  %v3622_v48 = vld [vmem:[#allocation2 + $0x1f0] ss:$0 sm:$0xff] }
0x119e   :  { %v2249_v50 = vmul.f32 %v4458_v49, %v4450_v15  ;;  %4250 = vmatpush3.bf16.xpose.msk.msra.mxu0 %vm4601_vm4, %v4245_v43  ;;  %4003 = vmatprep.subr.mxu1 %v1936_v63 }
0x11a0   :  { %4001 = vmatmul.mubr.msk.f32.vlgmr.msra.gmra.mrb[18].mxu1 %vm42_vm0, %v2249_v50 }
0x11a1   :  { %4004 = vmatpush3.msra.mxu1 %v1936_v63 }
0x11a2   :  { %4008 = vmatprep.subr.mxu1 %v1935_v0 }
0x11a5   :  { %4037 = vmatmul.mubr.msk.f32.vlgmr.msra.gmra.mrb[22].mxu0 %vm420_vm3, %v2785_v51 }
0x11cb   :  { %v2592_v52 = vpop.xlane.xlu1 %2591  ;;  %v2595_v53 = vpop.xlane.xlu0 %2594 }
0x11cc   :  { %v2596_v54 = vsub.f32 %v2582_v19, %v2592_v52  ;;  %v2597_v55 = vsub.f32 %v2587_v17, %v2595_v53 }
0x11ce   :  { %v2598_v56 = vmul.f32 1.442695, %v2596_v54  ;;  %v2600_v57 = vmul.f32 1.442695, %v2597_v55 }
0x11d0   :  { %4459 = vpow2.f32 %v2598_v56 }
0x11d1   :  { %4461 = vpow2.f32 %v2600_v57 }
0x11da   :  { %v4460_v58 = vpop.eup %4459 }
0x11db   :  { %v4462_v59 = vpop.eup %4461  ;;  %v2602_v62 = vsel %vm42_vm0, %v4460_v58, 0.0 }
0x11dc   :  { %2603 = vadd.xlane.f32.xlu0 %v2602_v62  ;;  %v2605_v7 = vsel %vm42_vm0, %v4462_v59, 0.0 }
0x11dd   :  { %2606 = vadd.xlane.f32.xlu1 %v2605_v7 }
0x11f2   :  { %4390 = vrot.lane.b32.xlu0 %v4721_v29, %s4523_s6 }
0x1269   :  { %v2604_v1 = vpop.xlane.xlu0 %2603 }
0x126a   :  { %v2607_v4 = vpop.xlane.xlu1 %2606  ;;  %4463 = vrcp.f32 %v2604_v1 }
0x126b   :  { %4465 = vrcp.f32 %v2607_v4  ;;  %v3116_v4 = vld [vmem:[#allocation2 + $0x218] sm:$0xff] }
0x126d   :  { %v4391_v22 = vpop.permute.xlu0 %4390 }
0x126e   :  { %v3988_v21 = vpop.f32.mrb[16].mxu1  ;;  %v4393_v5 = vunpack.i.h.bf16 %v4391_v22  ;;  %v4392_v6 = vunpack.i.l.bf16 %v4391_v22  ;;  %v3115_v22 = vld [vmem:[#allocation2 + $0x210] sm:$0xff] }
0x126f   :  { %v2128_v2 = vpop.f32.mrb[17].mxu1 }
0x1270   :  { %v4241_v10 = vpack.c.bf16 %v4393_v5, %v4392_v6  ;;  %v3117_v5 = vld [vmem:[#allocation2 + $0x220] sm:$0xff] }
0x1271   :  { %v4259_v6 = vpack.c.bf16 %v3117_v5, %v3116_v4 }
0x1273   :  { %v4002_v8 = vpop.f32.mrb[18].mxu1 }
0x1274   :  { %v2328_v9 = vpop.f32.mrb[19].mxu1  ;;  %v4464_v13 = vpop.eup %4463 }
0x1275   :  { %4005 = vmatprep.mubr.msk.f32.mxu1 %vm420_vm3, %v2328_v9  ;;  %v4466_v16 = vpop.eup %4465  ;;  %v2609_v17 = vmul.f32 %v4464_v13, %v4460_v58 }
0x1276   :  { %4006 = vmatmul.mubr.msk.f32.vlgmr.msra.gmra.mrb[20].mxu1 %vm420_vm3, %v4002_v8  ;;  %v2611_v19 = vmul.f32 %v4466_v16, %v4462_v59  ;;  %v3624_v16 = vld [vmem:[#allocation2 + $0x200] ss:$0 sm:$0xff] }
0x1277   :  { %4009 = vmatpush3.msra.mxu1 %v1935_v0  ;;  %4010 = vmatprep.mubr.msk.f32.mxu1 %vm420_vm3, %v2128_v2 }
0x1278   :  { %v4038_v11 = vpop.f32.mrb[22].mxu0  ;;  %4242 = vmatprep.subr.bf16.mxu1 %v4241_v10 }
0x1279   :  { %v2864_v12 = vpop.f32.mrb[23].mxu0  ;;  %v2870_v14 = vadd.f32 %v4038_v11, %v4755_v44 }
0x127a   :  { %v2865_v3 = vadd.f32 %v2864_v12, %v4757_v45 }
0x127b   :  { %v2876_v20 = vsel %vm42_vm0, %v2870_v14, -inf }
0x127c   :  { %v2873_v15 = vsel %vm42_vm0, %v2865_v3, -inf }
0x127d   :  { %2874 = vmax.xlane.f32.xlu1 %v2873_v15 }
0x127e   :  { %4011 = vmatmul.mubr.msk.f32.vlgmr.msra.gmra.mrb[20].mxu1 %vm420_vm3, %v3988_v21 }
0x127f   :  { %4244 = vmatpush3.bf16.msra.mxu1 %v4241_v10  ;;  %4024 = vmatprep.mubr.msk.f32.mxu1 %vm42_vm0, %v2609_v17 }
0x1280   :  { %4027 = vmatprep.subr.mxu1 %v1937_v24 }
0x1281   :  { %2877 = vmax.xlane.f32.xlu1 %v2876_v20 }
0x1282   :  { %4025 = vmatmul.mubr.msk.f32.vlgmr.msra.gmra.mrb[22].mxu1 %vm42_vm0, %v2611_v19 }
0x1283   :  { %4028 = vmatpush3.msra.mxu1 %v1937_v24 }
0x130a   :  { %v2875_v44 = vpop.xlane.xlu1 %2874 }
0x130b   :  { %v2879_v45 = vsub.f32 %v2865_v3, %v2875_v44 }
0x130d   :  { %v2881_v28 = vmul.f32 1.442695, %v2879_v45 }
0x130e   :  { %v2878_v25 = vpop.xlane.xlu1 %2877 }
0x130f   :  { %v2880_v27 = vsub.f32 %v2870_v14, %v2878_v25  ;;  %v3623_v14 = vld [vmem:[#allocation2 + $0x1f8] ss:$0 sm:$0xff]  ;;  %v3222_v25 = vld [vmem:[#allocation2 + $0x230] sm:$0xff] }
0x1311   :  { %v2883_v30 = vmul.f32 1.442695, %v2880_v27  ;;  %v3223_v27 = vld [vmem:[#allocation2 + $0x238] sm:$0xff] }
0x1313   :  { %4467 = vpow2.f32 %v2883_v30  ;;  %v3224_v30 = vld [vmem:[#allocation2 + $0x240] sm:$0xff] }
0x1314   :  { %4469 = vpow2.f32 %v2881_v28  ;;  %v4263_v28 = vpack.c.bf16 %v3223_v27, %v3222_v25 }
0x131d   :  { %v4468_v31 = vpop.eup %4467 }
0x131e   :  { %v2888_v32 = vsel %vm42_vm0, %v4468_v31, 0.0  ;;  %v4470_v26 = vpop.eup %4469 }
0x131f   :  { %2889 = vadd.xlane.f32.xlu1 %v2888_v32  ;;  %v2885_v33 = vsel %vm42_vm0, %v4470_v26, 0.0 }
0x1323   :  { %2886 = vadd.xlane.f32.xlu1 %v2885_v33  ;;  %v3227_v33 = vld [vmem:[#allocation2 + $0x258] sm:$0xff] }
0x1334   :  { %4395 = vrot.lane.b32.xlu1 %v4721_v29, %s4524_s7 }
0x1355   :  { %v4026_v34 = vpop.f32.mrb[22].mxu1 }
0x1356   :  { %v2690_v35 = vpop.f32.mrb[23].mxu1 }
0x1357   :  { %4029 = vmatprep.mubr.msk.f32.mxu1 %vm420_vm3, %v2690_v35  ;;  %v3228_v35 = vld [vmem:[#allocation2 + $0x260] sm:$0xff] }
0x1358   :  { %4030 = vmatmul.mubr.msk.f32.vlgmr.msra.gmra.mrb[20].mxu1 %vm420_vm3, %v4026_v34 }
0x13ac   :  { %v2890_v36 = vpop.xlane.xlu1 %2889 }
0x13ad   :  { %4471 = vrcp.f32 %v2890_v36  ;;  %v3229_v36 = vld [vmem:[#allocation2 + $0x268] sm:$0xff] }
0x13b0   :  { %v2887_v37 = vpop.xlane.xlu1 %2886 }
0x13b1   :  { %4473 = vrcp.f32 %v2887_v37  ;;  %v4275_v37 = vpack.c.bf16 %v3229_v36, %v3228_v35 }
0x13b4   :  { %v4396_v38 = vpop.permute.xlu1 %4395 }
0x13b5   :  { %v4398_v39 = vunpack.i.h.bf16 %v4396_v38  ;;  %v4397_v40 = vunpack.i.l.bf16 %v4396_v38  ;;  %v3625_v38 = vld [vmem:[#allocation2 + $0x228] ss:$0 sm:$0xff] }
0x13b7   :  { %v4251_v41 = vpack.c.bf16 %v4398_v39, %v4397_v40  ;;  %v4472_v61 = vpop.eup %4471 }
0x13b8   :  { %v2894_v43 = vmul.f32 %v4472_v61, %v4468_v31  ;;  %v3225_v31 = vld [vmem:[#allocation2 + $0x248] sm:$0xff] }
0x13b9   :  { %4252 = vmatprep.subr.bf16.mxu1 %v4251_v41  ;;  %v4267_v32 = vpack.c.bf16 %v3225_v31, %v3224_v30  ;;  %v3631_v30 = vld [vmem:[#allocation2 + $0x278] ss:$0 sm:$0xff] }
0x13ba   :  { %4254 = vmatpush3.bf16.msra.mxu1 %v4251_v41 }
0x13bb   :  { %v4474_v60 = vpop.eup %4473  ;;  %4046 = vmatprep.subr.mxu1 %v1938_v42 }
0x13bc   :  { %v2892_v29 = vmul.f32 %v4474_v60, %v4470_v26  ;;  %v3226_v26 = vld [vmem:[#allocation2 + $0x250] sm:$0xff] }
0x13bd   :  { %v4271_v34 = vpack.c.bf16 %v3227_v33, %v3226_v26 }
0x13be   :  { %4043 = vmatprep.mubr.msk.f32.mxu1 %vm42_vm0, %v2892_v29 }
0x13bf   :  { %4044 = vmatmul.mubr.msk.f32.vlgmr.msra.gmra.mrb[24].mxu1 %vm42_vm0, %v2894_v43 }
0x13c0   :  { %4047 = vmatpush3.msra.mxu1 %v1938_v42 }
0x13c1   :  { %4264 = vmatprep.subr.bf16.mxu1 %v4263_v28 }
0x1492   :  { %v4045_v46 = vpop.f32.mrb[24].mxu1 }
0x1493   :  { %v2973_v47 = vpop.f32.mrb[25].mxu1 }
0x1494   :  { %4048 = vmatprep.mubr.msk.f32.mxu1 %vm420_vm3, %v2973_v47 }
0x1495   :  { %4049 = vmatmul.mubr.msk.f32.vlgmr.msra.gmra.mrb[20].mxu1 %vm420_vm3, %v4045_v46 }
0x1496   :  { %4266 = vmatpush3.bf16.msra.mxu1 %v4263_v28 }
0x1497   :  { %4268 = vmatprep.subr.bf16.mxu1 %v4267_v32 }
0x149a   :  { %4270 = vmatpush3.bf16.msra.mxu1 %v4267_v32  ;;  %v3632_v32 = vld [vmem:[#allocation2 + $0x280] ss:$0 sm:$0xff] }
0x149b   :  { %4272 = vmatprep.subr.bf16.mxu1 %v4271_v34 }
0x149e   :  { %4274 = vmatpush3.bf16.msra.mxu1 %v4271_v34 }
0x149f   :  { %4276 = vmatprep.subr.bf16.mxu1 %v4275_v37 }
0x14a2   :  { %4278 = vmatpush3.bf16.msra.mxu1 %v4275_v37 }
0x1568   :  { %v4050_v49 = vpop.f32.mrb[20].mxu1 }
0x1569   :  { %v3071_v50 = vadd.f32 %v4050_v49, %v3622_v48  ;;  %v3054_v51 = vpop.f32.mrb[21].mxu1 }
0x156a   :  { %v3070_v52 = vadd.f32 %v3622_v48, %v3054_v51 }
0x156b   :  { %v3073_v53 = vadd.f32 %v3071_v50, %v4709_v23 }
0x156c   :  { %v3072_v54 = vadd.f32 %v3070_v52, %v4705_v18  ;;  %v3114_v18 = vld [vmem:[#allocation2 + $0x208] sm:$0xff] }
0x156d   :  { %v3077_v55 = vsel %vm326_vm2, %v3073_v53, 0.0  ;;  %v4255_v2 = vpack.c.bf16 %v3115_v22, %v3114_v18 }
0x156e   :  { %3078 = vadd.xlane.f32.xlu1 %v3077_v55  ;;  %v3074_v56 = vsel %vm326_vm2, %v3072_v54, 0.0 }
0x156f   :  { %3075 = vadd.xlane.f32.xlu0 %v3074_v56  ;;  %4256 = vmatprep.subr.bf16.mxu0 %v4255_v2 }
0x1570   :  { %4258 = vmatpush3.bf16.msra.mxu0 %v4255_v2 }
0x1571   :  { %4260 = vmatprep.subr.bf16.mxu0 %v4259_v6 }
0x1574   :  { %4262 = vmatpush3.bf16.msra.mxu0 %v4259_v6 }
0x15fb   :  { %v3079_v57 = vpop.xlane.xlu1 %3078 }
0x15fc   :  { %v3081_v58 = vmul.f32 0.03125, %v3079_v57  ;;  %v3076_v59 = vpop.xlane.xlu0 %3075 }
0x15fd   :  { %v3080_v62 = vmul.f32 0.03125, %v3076_v59 }
0x15fe   :  { %v3083_v7 = vsub.f32 %v3073_v53, %v3081_v58 }
0x15ff   :  { %v3082_v63 = vsub.f32 %v3072_v54, %v3080_v62  ;;  %v3628_v62 = vld [vmem:[#allocation2 + $0x270] ss:$0 sm:$0xff] }
0x1600   :  { %v3085_v21 = vmul.f32 %v3083_v7, %v3083_v7 }
0x1601   :  { %v3084_v0 = vmul.f32 %v3082_v63, %v3082_v63 }
0x1602   :  { %v3089_v23 = vsel %vm326_vm2, %v3085_v21, 0.0 }
0x1603   :  { %v3086_v1 = vsel %vm326_vm2, %v3084_v0, 0.0 }
0x1604   :  { %3087 = vadd.xlane.f32.xlu0 %v3086_v1 }
0x1608   :  { %3090 = vadd.xlane.f32.xlu0 %v3089_v23 }
0x1691   :  { %v3088_v8 = vpop.xlane.xlu0 %3087 }
0x1692   :  { %v3092_v9 = vmul.f32 0.03125, %v3088_v8 }
0x1694   :  { %v3094_v10 = vadd.f32 1e-05, %v3092_v9 }
0x1695   :  { %v3091_v11 = vpop.xlane.xlu0 %3090 }
0x1696   :  { %4475 = vrsqrt.f32 %v3094_v10  ;;  %v3093_v12 = vmul.f32 0.03125, %v3091_v11 }
0x1698   :  { %v3095_v13 = vadd.f32 1e-05, %v3093_v12 }
0x169a   :  { %4477 = vrsqrt.f32 %v3095_v13 }
0x16a0   :  { %v4476_v3 = vpop.eup %4475 }
0x16a1   :  { %v3098_v15 = vmul.f32 %v4476_v3, %v3082_v63  ;;  %v3358_v3 = vld [vmem:[#allocation2 + $0x2c8] sm:$0xff] }
0x16a3   :  { %v3105_v17 = vmul.f32 %v3623_v14, %v3098_v15 }
0x16a4   :  { %v4478_v19 = vpop.eup %4477 }
0x16a5   :  { %v3099_v20 = vmul.f32 %v4478_v19, %v3083_v7  ;;  %v3112_v24 = vadd.f32 %v3624_v16, %v3105_v17  ;;  %v3361_v17 = vld [vmem:[#allocation2 + $0x2e0] sm:$0xff] }
0x16a7   :  { %v3106_v44 = vmul.f32 %v3623_v14, %v3099_v20  ;;  %4059 = vmatprep.mubr.msk.f32.mxu0 %vm326_vm2, %v3112_v24  ;;  %v3359_v14 = vld [vmem:[#allocation2 + $0x2d0] sm:$0xff] }
0x16a8   :  { %v4279_v15 = vpack.c.bf16 %v3359_v14, %v3358_v3 }
0x16a9   :  { %v3113_v45 = vadd.f32 %v3624_v16, %v3106_v44  ;;  %v3360_v16 = vld [vmem:[#allocation2 + $0x2d8] sm:$0xff] }
0x16aa   :  { %4280 = vmatprep.subr.bf16.mxu0 %v4279_v15  ;;  %v4283_v19 = vpack.c.bf16 %v3361_v17, %v3360_v16 }
0x16ab   :  { %4060 = vmatmul.mubr.msk.f32.vlgmr.msra.gmra.mrb[24].mxu0 %vm326_vm2, %v3113_v45 }
0x16ac   :  { %4282 = vmatpush3.bf16.msra.mxu0 %v4279_v15 }
0x16ad   :  { %4284 = vmatprep.subr.bf16.mxu0 %v4283_v19 }
0x16b0   :  { %4286 = vmatpush3.bf16.msra.mxu0 %v4283_v19 }
0x177e   :  { %v4061_v39 = vpop.f32.mrb[24].mxu0 }
0x177f   :  { %v3201_v40 = vadd.f32 %v4061_v39, %v3625_v38  ;;  %v3195_v41 = vpop.f32.mrb[25].mxu0  ;;  %v4527_v39 = vmov 0.0  }
0x1780   :  { %v3196_v42 = vadd.f32 %v3625_v38, %v3195_v41  ;;  %v4525_v38 = vmov 0.0|0.0   ;;  %v3444_v41 = vld [vmem:[#allocation2 + $0x2e8] sm:$0xff] }
0x1781   :  { %v3205_v61 = vmul.f32 %v3201_v40, %v3201_v40  ;;  %4287 = vmatprep.subr.bf16.mxu0 %v4525_v38 }
0x1782   :  { %v3204_v60 = vmul.f32 %v3196_v42, %v3196_v42 }
0x1783   :  { %v3207_v29 = vmul.f32 %v3205_v61, %v3201_v40 }
0x1784   :  { %v3206_v43 = vmul.f32 %v3204_v60, %v3196_v42 }
0x1785   :  { %v3209_v46 = vmul.f32 0.044715, %v3207_v29 }
0x1786   :  { %v3208_v47 = vmul.f32 0.044715, %v3206_v43 }
0x1787   :  { %v3211_v48 = vadd.f32 %v3209_v46, %v3201_v40  ;;  %v3443_v46 = vld [vmem:[#allocation2 + $0x300] sm:$0x3] }
0x1788   :  { %v3210_v49 = vadd.f32 %v3208_v47, %v3196_v42  ;;  %v3635_v47 = vld [vmem:[#allocation2 + $0x2f8] ss:$0 sm:$0xff] }
0x1789   :  { %v3213_v50 = vmul.f32 0.7978846, %v3211_v48 }
0x178a   :  { %v3212_v51 = vmul.f32 0.7978846, %v3210_v49 }
0x178b   :  { %4479 = vtanh.f32 %v3213_v50 }
0x178c   :  { %4481 = vtanh.f32 %v3212_v51 }
0x1795   :  { %v4480_v52 = vpop.eup %4479 }
0x1796   :  { %v4482_v53 = vpop.eup %4481  ;;  %v3217_v54 = vadd.f32 1.0, %v4480_v52 }
0x1797   :  { %v3216_v55 = vadd.f32 1.0, %v4482_v53 }
0x1798   :  { %v3219_v56 = vmul.f32 0.5, %v3217_v54 }
0x1799   :  { %v3218_v57 = vmul.f32 0.5, %v3216_v55 }
0x179a   :  { %v3221_v59 = vmul.f32 %v3219_v56, %v3201_v40  ;;  %v3445_v40 = vld [vmem:[#allocation2 + $0x2f0] sm:$0xff] }
0x179b   :  { %v3220_v58 = vmul.f32 %v3218_v57, %v3196_v42 }
0x179d   :  { %4078 = vmatprep.mubr.msk.f32.mxu1 %vm139_vm1, %v3220_v58 }
0x179e   :  { %4079 = vmatmul.mubr.msk.f32.vlgmr.msra.gmra.mrb[26].mxu1 %vm139_vm1, %v3221_v59 }
0x1871   :  { %v4080_v7 = vpop.f32.mrb[26].mxu1 }
0x1872   :  { %v3307_v63 = vpop.f32.mrb[27].mxu1  ;;  %v3313_v0 = vadd.f32 %v4080_v7, %v3628_v62 }
0x1873   :  { %v3308_v1 = vadd.f32 %v3628_v62, %v3307_v63 }
0x1874   :  { %v3317_v18 = vadd.f32 %v3313_v0, %v3113_v45 }
0x1875   :  { %v3316_v21 = vadd.f32 %v3308_v1, %v3112_v24 }
0x1876   :  { %v3321_v22 = vsel %vm326_vm2, %v3317_v18, 0.0 }
0x1877   :  { %v3318_v23 = vsel %vm326_vm2, %v3316_v21, 0.0 }
0x1878   :  { %3319 = vadd.xlane.f32.xlu0 %v3318_v23 }
0x187c   :  { %3322 = vadd.xlane.f32.xlu0 %v3321_v22 }
0x1905   :  { %v3320_v2 = vpop.xlane.xlu0 %3319 }
0x1906   :  { %v3324_v4 = vmul.f32 0.03125, %v3320_v2 }
0x1908   :  { %v3326_v5 = vsub.f32 %v3316_v21, %v3324_v4 }
0x1909   :  { %v3323_v6 = vpop.xlane.xlu0 %3322 }
0x190a   :  { %v3325_v8 = vmul.f32 0.03125, %v3323_v6  ;;  %v3328_v9 = vmul.f32 %v3326_v5, %v3326_v5 }
0x190c   :  { %v3327_v10 = vsub.f32 %v3317_v18, %v3325_v8  ;;  %v3330_v11 = vsel %vm326_vm2, %v3328_v9, 0.0 }
0x190d   :  { %3331 = vadd.xlane.f32.xlu0 %v3330_v11 }
0x190e   :  { %v3329_v12 = vmul.f32 %v3327_v10, %v3327_v10 }
0x1910   :  { %v3333_v13 = vsel %vm326_vm2, %v3329_v12, 0.0 }
0x1911   :  { %3334 = vadd.xlane.f32.xlu1 %v3333_v13 }
0x199a   :  { %v3332_v20 = vpop.xlane.xlu0 %3331 }
0x199b   :  { %v3336_v24 = vmul.f32 0.03125, %v3332_v20 }
0x199d   :  { %v3338_v44 = vadd.f32 1e-05, %v3336_v24 }
0x199e   :  { %v3335_v45 = vpop.xlane.xlu1 %3334 }
0x199f   :  { %4483 = vrsqrt.f32 %v3338_v44  ;;  %v3337_v25 = vmul.f32 0.03125, %v3335_v45 }
0x19a1   :  { %v3339_v27 = vadd.f32 1e-05, %v3337_v25 }
0x19a3   :  { %4485 = vrsqrt.f32 %v3339_v27 }
0x19a9   :  { %v4484_v28 = vpop.eup %4483 }
0x19aa   :  { %v3342_v31 = vmul.f32 %v4484_v28, %v3326_v5 }
0x19ac   :  { %v3349_v26 = vmul.f32 %v3631_v30, %v3342_v31 }
0x19ad   :  { %v4486_v33 = vpop.eup %4485 }
0x19ae   :  { %v3343_v34 = vmul.f32 %v4486_v33, %v3327_v10  ;;  %v3356_v35 = vadd.f32 %v3632_v32, %v3349_v26 }
0x19b0   :  { %v3350_v36 = vmul.f32 %v3631_v30, %v3343_v34  ;;  %4089 = vmatprep.mubr.msk.f32.mxu0 %vm326_vm2, %v3356_v35 }
0x19b2   :  { %v3357_v37 = vadd.f32 %v3632_v32, %v3350_v36 }
0x19b4   :  { %4090 = vmatmul.mubr.msk.f32.vlgmr.msra.gmra.mrb[26].mxu0 %vm326_vm2, %v3357_v37 }
0x19b5   :  { %4096 = vmatprep.mubr.msk.f32.mxu0 %vm4526_vm5, %v4527_v39 }
0x1a87   :  { %v4091_v42 = vpop.f32.mrb[26].mxu0 }
0x1a88   :  { %v3447_v61 = vmul.f32 %v4091_v42, %v3445_v40  ;;  %v3434_v60 = vpop.f32.mrb[27].mxu0 }
0x1a89   :  { %v3446_v29 = vmul.f32 %v3444_v41, %v3434_v60 }
0x1a8b   :  { %v4288_v43 = vpack.c.bf16 %v3447_v61, %v3446_v29 }
0x1a8d   :  { %4289 = vmatpush3.bf16.msra.mxu0 %v4288_v43 }
0x1a90   :  { %4097 = vmatmul.mubr.msk.f32.vlgmr.msra.gmra.mrb[28].mxu0 %vm42_vm0, %v3443_v46 }
0x1b63   :  { %v3522_v48 = vpop.f32.mrb[28].mxu0 }
0x1b64   :  { %v3523_v49 = vadd.f32 %v3635_v47, %v3522_v48  ;;  %v4098_v50 = vpop.f32.mrb[29].mxu0 }
0x1b66   :  { %3526 = vst [vmem:[%s4841_s2] sm:$0x3] %v3523_v49 }
0x1b67   :  { %3531 = vsyncpa [#allocation3], 1 }

</bundles_post_ra>
